<compile_context>
chip_gen: v5e
topology: v5e:2x2
jax: 0.10.0
libtpu: 0.0.40
codegen_flags: <defaults>
</compile_context>

<pallas_src>
import functools
from itertools import accumulate

import numpy as np
import jax
import jax.numpy as jnp
from jax.experimental import pallas as pl
from jax.experimental.pallas import tpu as pltpu

# ----------------------------- config ---------------------------------------
HIDDEN = 32                 # args.hidden_dim
NUM_LAYERS = 2              # args.num_layers
OUTPUT_DIM = 2              # output_dim
PROTO_PER_CLASS = 3         # args.num_prototypes_per_class
NUM_PROTOS = OUTPUT_DIM * PROTO_PER_CLASS
NODES_PER_GRAPH = 8
N_GRAPHS = 2
N_NODES = N_GRAPHS * NODES_PER_GRAPH
ATOM_FEATS = 2              # synthetic AtomEncoder: 2 integer features / node
ATOM_VOCAB = 8
GIN_EPS = 0.0               # GINConv eps (init 0)
PROTO_EPS = 1e-4            # self.epsilon in prototype_distance
KL_EPS = 1e-7

assert OUTPUT_DIM == 2      # width-2 slice softmax / EYE=ones(2) baked into model

# Packed, lane-dense graph-level output slab (width = one full 128-lane row).
SLAB_W = 128
_C = OUTPUT_DIM
_P = NUM_PROTOS
COL_LOGITS = 0
COL_PROBS = COL_LOGITS + _C
COL_SIM = COL_PROBS + _C
COL_DIST = COL_SIM + _P
COL_GEMB = COL_DIST + _P
COL_KL = COL_GEMB + HIDDEN
COL_PEN = COL_KL + 1
SLAB_USED = COL_PEN + 1
assert SLAB_USED <= SLAB_W


def full_spec(shape):
    nd = len(shape)
    return pl.BlockSpec(shape, lambda *args, nd=nd: (0,) * nd)


# ----------------------------- fused kernel ----------------------------------
def gnn_fused_kernel(
    adj_ref, x_ref, emb_ref, bmean_ref, gum_ref, unif_ref,
    w1s_ref, b1s_ref, w2s_ref, b2s_ref,
    wf1_ref, bf1_ref, wf2_ref, bf2_ref,
    pt_ref, wlast_ref,
    graph_slab_ref, node_lam_ref,
    *, num_nodes, num_layers, num_graphs,
):
    f32 = jnp.float32
    bf16 = jnp.bfloat16

    def mxdot(a_f32, w_bf16):
        # activation cast to bf16 at the MXU boundary; weights already bf16.
        return jnp.dot(a_f32.astype(bf16), w_bf16, preferred_element_type=f32)

    adj = adj_ref[...]                                    # (N, N) bf16 (0/1 exact)

    # ---- AtomEncoder: one-hot gather + sum as a single (exact) f32 matmul ----
    xi = x_ref[...]                                       # (N, F) int32
    vocab_ids = jax.lax.broadcasted_iota(jnp.int32, (num_nodes, ATOM_VOCAB), 1)
    onehots = []
    for k in range(ATOM_FEATS):
        onehots.append((xi[:, k:k + 1] == vocab_ids).astype(f32))
    onehot = jnp.concatenate(onehots, axis=1)             # (N, F*V)
    h = jnp.dot(onehot, emb_ref[...], preferred_element_type=f32)   # (N, H) f32

    # ---- GIN message passing: both layers fused, h never leaves VMEM --------
    # TODO(synk): GINConv BatchNorm and edge-attribute embeddings are omitted
    # (dense-adjacency aggregation only).
    for l in range(num_layers):
        agg = jnp.dot(adj, h.astype(bf16), preferred_element_type=f32)
        z = (1.0 + GIN_EPS) * h + agg
        hid = jnp.maximum(mxdot(z, w1s_ref[l]) + b1s_ref[l], 0.0)
        h = mxdot(hid, w2s_ref[l]) + b2s_ref[l]

    # ---- node head: fc1/tanh, fc2/softmax(dim=1) via width-2 slice math ------
    abstract = jnp.tanh(mxdot(h, wf1_ref[...]) + bf1_ref[...])        # (N, H)
    fc2 = mxdot(abstract, wf2_ref[...]) + bf2_ref[...]                # (N, 2)
    x0, x1 = fc2[:, 0:1], fc2[:, 1:2]
    m = jnp.maximum(x0, x1)
    e0 = jnp.exp(x0 - m)
    e1 = jnp.exp(x1 - m)
    inv = pl.reciprocal(e0 + e1, approx=True)
    a0 = e0 * inv
    a1 = e1 * inv                                                     # softmax cols

    # gumbel softmax (tau=1) applied to the probabilities, as in the reference.
    gum = gum_ref[...]                                                # (N, 2)
    g0 = a0 + gum[:, 0:1]
    g1 = a1 + gum[:, 1:2]
    gm = jnp.maximum(g0, g1)
    eg0 = jnp.exp(g0 - gm)
    eg1 = jnp.exp(g1 - gm)
    ginv = pl.reciprocal(eg0 + eg1, approx=True)
    lambda_pos = eg0 * ginv                                           # (N, 1)
    lambda_neg = eg1 * ginv                                           # (N, 1)

    # ---- node feature statistics (unbiased std, like torch.std_mean) --------
    mean = jnp.mean(h, axis=0, keepdims=True)                         # (1, H)
    var = jnp.sum((h - mean) ** 2, axis=0, keepdims=True) * (1.0 / (num_nodes - 1))
    std = jnp.sqrt(var)                                               # (1, H)

    noisy_mean = lambda_pos * h + lambda_neg * mean                   # (N, H)
    noisy_std = lambda_neg * std                                      # (N, H)
    noisy = noisy_mean + unif_ref[...] * noisy_std                    # (N, H)

    # ---- mean readout (bmean already row-normalized: B / |graph|) -----------
    graph_emb = jnp.dot(bmean_ref[...], noisy, preferred_element_type=f32)  # (G, H)

    # ---- KL loss (exact division: eps=1e-7 is below approx-recip error) -----
    inv_d = 1.0 / (std + KL_EPS)                                      # (1, H)
    kl_tensor = 0.5 * (noisy_std * inv_d) ** 2 + jnp.sum(
        ((noisy_mean - mean) * inv_d) ** 2, axis=0, keepdims=True)
    kl = jnp.mean(kl_tensor, keepdims=True)                           # (1, 1)

    # ---- connectivity penalty: diag(row-L1-norm(S^T A S)) vs ones(2) --------
    assignment = jnp.concatenate([a0, a1], axis=1)                    # (N, 2)
    tmp = jnp.dot(adj, assignment.astype(bf16), preferred_element_type=f32)  # (N, 2)
    t0, t1 = tmp[:, 0:1], tmp[:, 1:2]
    # all four entries of S^T A S in one MXU op: ones(1,N) @ [S*t0 | S*t1]
    pen_in = jnp.concatenate([assignment * t0, assignment * t1], axis=1)  # (N, 4)
    ones_row = jnp.ones((1, num_nodes), f32)
    sums = jnp.dot(ones_row, pen_in, preferred_element_type=f32)      # (1, 4)
    n00, n10 = sums[:, 0:1], sums[:, 1:2]
    n01, n11 = sums[:, 2:3], sums[:, 3:4]
    row0 = jnp.maximum(jnp.abs(n00) + jnp.abs(n01), 1e-12)            # F.normalize p=1
    row1 = jnp.maximum(jnp.abs(n10) + jnp.abs(n11), 1e-12)
    d0 = n00 / row0
    d1 = n11 / row1
    pos_penalty = 0.5 * ((d0 - 1.0) ** 2 + (d1 - 1.0) ** 2)           # (1, 1)

    # ---- prototype distance / similarity (f32 for accuracy, exact division) -
    pt = pt_ref[...]                                                  # (H, P) f32
    xp = jnp.dot(graph_emb, pt, preferred_element_type=f32)           # (G, P)
    ge_sq = jnp.sum(graph_emb ** 2, axis=1, keepdims=True)            # (G, 1)
    p_sq = jnp.sum(pt ** 2, axis=0, keepdims=True)                    # (1, P)
    distance = -2.0 * xp + ge_sq + p_sq
    similarity = jnp.log((distance + 1.0) / (distance + PROTO_EPS))

    # ---- classifier fused into a single matmul -------------------------------
    final = jnp.concatenate([similarity, graph_emb], axis=1)          # (G, P+H)
    logits = mxdot(final, wlast_ref[...])                             # (G, 2)
    l0, l1 = logits[:, 0:1], logits[:, 1:2]
    lm = jnp.maximum(l0, l1)
    el0 = jnp.exp(l0 - lm)
    el1 = jnp.exp(l1 - lm)
    linv = pl.reciprocal(el0 + el1, approx=True)
    probs = jnp.concatenate([el0 * linv, el1 * linv], axis=1)         # (G, 2)

    # ---- single full-width, lane-dense graph-slab store ----------------------
    packed = jnp.concatenate(
        [logits, probs, similarity, distance, graph_emb,
         jnp.broadcast_to(kl, (num_graphs, 1)),
         jnp.broadcast_to(pos_penalty, (num_graphs, 1)),
         jnp.zeros((num_graphs, SLAB_W - SLAB_USED), f32)],
        axis=1)                                                       # (G, 128)
    graph_slab_ref[...] = packed

    # Per-node lambda_pos, no lane broadcast.
    # TODO(synk): for N >> 128, pack lambda lane-major (128 nodes per row)
    # to keep the writeback dense/unmasked.
    node_lam_ref[...] = lambda_pos                                    # (N, 1)


def gnn_pallas_forward(x_int, adj_bf16, b_mean, gumbel, unif, params):
    n = x_int.shape[0]
    g = b_mean.shape[0]
    inputs = (adj_bf16, x_int, params["emb_table"], b_mean, gumbel, unif,
              params["w1s"], params["b1s"], params["w2s"], params["b2s"],
              params["wf1"], params["bf1"], params["wf2"], params["bf2"],
              params["proto_t"], params["w_last"])
    out_shapes = (jax.ShapeDtypeStruct((g, SLAB_W), jnp.float32),   # graph slab
                  jax.ShapeDtypeStruct((n, 1), jnp.float32))        # lambda_pos
    kernel = functools.partial(gnn_fused_kernel, num_nodes=n,
                               num_layers=NUM_LAYERS, num_graphs=g)
    # TODO(synk): at large batch/node counts, add a per-graph "parallel" grid
    # axis (tiling the block-diagonal adjacency and B_mean) so the [N,N] block
    # never exceeds VMEM (notably 64 MiB on v7x) and the two v7x TensorCores
    # split the batch; the cross-graph std/mean, KL and connectivity penalty
    # then need a second accumulation pass.
    return pl.pallas_call(
        kernel,
        out_shape=out_shapes,
        grid=(1,),
        in_specs=[full_spec(a.shape) for a in inputs],
        out_specs=[full_spec(s.shape) for s in out_shapes],
        compiler_params=pltpu.CompilerParams(dimension_semantics=("arbitrary",)),
    )(*inputs)


# ----------------------------- parameter init --------------------------------
def linear_init(key, fan_in, shape):
    bound = 1.0 / np.sqrt(fan_in)
    return jax.random.uniform(key, shape, jnp.float32, -bound, bound)


def build_params(key):
    n_keys = ATOM_FEATS + 4 * NUM_LAYERS + 4 + 1 + 1
    keys = jax.random.split(key, n_keys)
    ki = iter(keys)
    params = {}
    bf16 = jnp.bfloat16

    # AtomEncoder: per-feature embedding tables, stacked (feature-major) for
    # the in-kernel one-hot gather. Kept f32 (gather must be exact).
    atom_tables = [
        0.1 * jax.random.normal(next(ki), (ATOM_VOCAB, HIDDEN), jnp.float32)
        for _ in range(ATOM_FEATS)
    ]
    params["emb_table"] = jnp.concatenate(atom_tables, axis=0)   # (F*V, H) f32

    # GIN layers: MLP Linear(H, 2H) -> ReLU -> Linear(2H, H), stacked per layer.
    # Weights pre-cast to bf16 (MXU inputs); biases stay f32 (added post-acc).
    w1l, b1l, w2l, b2l = [], [], [], []
    for _ in range(NUM_LAYERS):
        w1l.append(linear_init(next(ki), HIDDEN, (HIDDEN, 2 * HIDDEN)))
        b1l.append(linear_init(next(ki), HIDDEN, (1, 2 * HIDDEN)))
        w2l.append(linear_init(next(ki), 2 * HIDDEN, (2 * HIDDEN, HIDDEN)))
        b2l.append(linear_init(next(ki), 2 * HIDDEN, (1, HIDDEN)))
    params["w1s"] = jnp.stack(w1l).astype(bf16)      # (L, H, 2H) bf16
    params["b1s"] = jnp.stack(b1l)                   # (L, 1, 2H) f32
    params["w2s"] = jnp.stack(w2l).astype(bf16)      # (L, 2H, H) bf16
    params["b2s"] = jnp.stack(b2l)                   # (L, 1, H)  f32

    params["wf1"] = linear_init(next(ki), HIDDEN, (HIDDEN, HIDDEN)).astype(bf16)
    params["bf1"] = linear_init(next(ki), HIDDEN, (1, HIDDEN))
    params["wf2"] = linear_init(next(ki), HIDDEN, (HIDDEN, 2)).astype(bf16)
    params["bf2"] = linear_init(next(ki), HIDDEN, (1, 2))

    # prototype_vectors = torch.rand(...) -> uniform [0, 1); kept f32 (distance
    # / log-similarity are epsilon-sensitive).
    protos = jax.random.uniform(next(ki), (NUM_PROTOS, HIDDEN), jnp.float32)
    params["proto_t"] = protos.T                                     # (H, P) f32

    # last_layer: Linear(H + P, C, bias=False); prototype block set by
    # set_last_layer_incorrect_connection(-0.5). Fused into one (P+H, C) weight
    # matching final = cat(similarity, graph_emb).
    identity = np.zeros((NUM_PROTOS, OUTPUT_DIM), np.float32)
    for j in range(NUM_PROTOS):
        identity[j, j // PROTO_PER_CLASS] = 1.0
    pos = identity.T                                                 # (C, P)
    w_proto_block = 1.0 * pos + (-0.5) * (1.0 - pos)                 # (C, P)
    w_emb_block = linear_init(next(ki), HIDDEN + NUM_PROTOS, (OUTPUT_DIM, HIDDEN))
    wlp = jnp.asarray(w_proto_block).T                               # (P, C)
    wle = w_emb_block.T                                              # (H, C)
    params["w_last"] = jnp.concatenate([wlp, wle], axis=0).astype(bf16)  # (P+H, C)
    return params


# ----------------------------- full forward ----------------------------------
@jax.jit
def gnn_nets_forward(params, x_int, adj_bf16, b_mean, gumbel, unif):
    graph_slab, node_lam = gnn_pallas_forward(x_int, adj_bf16, b_mean,
                                              gumbel, unif, params)
    logits = graph_slab[:, COL_LOGITS:COL_LOGITS + _C]
    probs = graph_slab[:, COL_PROBS:COL_PROBS + _C]
    sim_matrix = graph_slab[:, COL_SIM:COL_SIM + _P]
    min_distance = graph_slab[:, COL_DIST:COL_DIST + _P]
    graph_emb = graph_slab[:, COL_GEMB:COL_GEMB + HIDDEN]
    kl_loss = graph_slab[0, COL_KL]
    pos_penalty = graph_slab[0, COL_PEN]
    lambda_pos = node_lam[:, 0]
    return (logits, probs, graph_emb, kl_loss, pos_penalty,
            sim_matrix, min_distance, lambda_pos)


def extract_active_node_index(lambda_pos, batch):
    # Ragged python list-of-lists like the reference; host side, OFF the
    # device hot path (call after the jitted forward has been synced).
    lpos = np.asarray(lambda_pos)
    active = lpos > 0.5
    batch_np = np.asarray(batch)
    node_number = [0]
    for i in range(int(batch_np[-1]) + 1):
        node_number.append(int((batch_np == i).sum()))
    node_number = list(accumulate(node_number))
    return [
        np.nonzero(active[node_number[j]:node_number[j + 1]])[0].tolist()
        for j in range(len(node_number) - 1)
    ]


# ----------------------------- main ------------------------------------------
if __name__ == "__main__":
    key = jax.random.PRNGKey(0)
    kp, kx, kg, ku = jax.random.split(key, 4)

    params = build_params(kp)

    # Synthetic batched graph: 2 graphs x 8 nodes, ring edges within each graph.
    x_int = jax.random.randint(kx, (N_NODES, ATOM_FEATS), 0, ATOM_VOCAB,
                               dtype=jnp.int32)
    batch = np.repeat(np.arange(N_GRAPHS), NODES_PER_GRAPH).astype(np.int32)

    src, dst = [], []
    for gi in range(N_GRAPHS):
        base = gi * NODES_PER_GRAPH
        for i in range(NODES_PER_GRAPH):
            a, b = base + i, base + (i + 1) % NODES_PER_GRAPH
            src += [a, b]
            dst += [b, a]
    adj_np = np.zeros((N_NODES, N_NODES), np.float32)
    adj_np[np.asarray(src), np.asarray(dst)] = 1.0
    adj_bf16 = jnp.asarray(adj_np, jnp.bfloat16)   # 0/1 exact in bf16, half the DMA

    onehot = (batch[None, :] == np.arange(N_GRAPHS)[:, None]).astype(np.float32)
    b_mean = jnp.asarray(onehot / onehot.sum(axis=1, keepdims=True))   # (G, N)

    # Pre-sampled randomness (gumbel noise for gumbel_softmax, uniform for
    # torch.rand_like) so the kernel itself is deterministic.
    gumbel = jax.random.gumbel(kg, (N_NODES, 2), jnp.float32)
    unif = jax.random.uniform(ku, (N_NODES, HIDDEN), jnp.float32)

    (logits, probs, graph_emb, kl_loss, pos_penalty,
     sim_matrix, min_distance, lambda_pos) = jax.block_until_ready(
        gnn_nets_forward(params, x_int, adj_bf16, b_mean, gumbel, unif))

    # Host-side ragged extraction, off the timed device path.
    active_node_index = extract_active_node_index(lambda_pos, batch)
    outputs = (logits, probs, active_node_index, graph_emb,
               kl_loss, pos_penalty, sim_matrix, min_distance)
    del outputs

    print("KERNEL_OK")
</pallas_src>

<mosaic_0001>
module attributes {stable_mosaic.version = 11 : i64} {
  func.func @gnn_fused_kernel(%arg0: i32, %arg1: memref<16x16xbf16, #tpu.memory_space<vmem>>, %arg2: memref<16x2xi32, #tpu.memory_space<vmem>>, %arg3: memref<16x32xf32, #tpu.memory_space<vmem>>, %arg4: memref<2x16xf32, #tpu.memory_space<vmem>>, %arg5: memref<16x2xf32, #tpu.memory_space<vmem>>, %arg6: memref<16x32xf32, #tpu.memory_space<vmem>>, %arg7: memref<2x32x64xbf16, #tpu.memory_space<vmem>>, %arg8: memref<2x1x64xf32, #tpu.memory_space<vmem>>, %arg9: memref<2x64x32xbf16, #tpu.memory_space<vmem>>, %arg10: memref<2x1x32xf32, #tpu.memory_space<vmem>>, %arg11: memref<32x32xbf16, #tpu.memory_space<vmem>>, %arg12: memref<1x32xf32, #tpu.memory_space<vmem>>, %arg13: memref<32x2xbf16, #tpu.memory_space<vmem>>, %arg14: memref<1x2xf32, #tpu.memory_space<vmem>>, %arg15: memref<32x6xf32, #tpu.memory_space<vmem>>, %arg16: memref<38x2xbf16, #tpu.memory_space<vmem>>, %arg17: memref<2x128xf32, #tpu.memory_space<vmem>>, %arg18: memref<16x1xf32, #tpu.memory_space<vmem>>) attributes {dimension_semantics = [#tpu.dimension_semantics<arbitrary>], iteration_bounds = array<i64: 1>, scalar_prefetch = 0 : i64, scratch_operands = 0 : i64, tpu.core_type = #tpu.core_type<tc>, window_params = [{pipeline_mode = #tpu.pipeline_mode<synchronous>, transform_indices = @transform_0, window_bounds = array<i64: 16, 16>}, {pipeline_mode = #tpu.pipeline_mode<synchronous>, transform_indices = @transform_1, window_bounds = array<i64: 16, 2>}, {pipeline_mode = #tpu.pipeline_mode<synchronous>, transform_indices = @transform_2, window_bounds = array<i64: 16, 32>}, {pipeline_mode = #tpu.pipeline_mode<synchronous>, transform_indices = @transform_3, window_bounds = array<i64: 2, 16>}, {pipeline_mode = #tpu.pipeline_mode<synchronous>, transform_indices = @transform_4, window_bounds = array<i64: 16, 2>}, {pipeline_mode = #tpu.pipeline_mode<synchronous>, transform_indices = @transform_5, window_bounds = array<i64: 16, 32>}, {pipeline_mode = #tpu.pipeline_mode<synchronous>, transform_indices = @transform_6, window_bounds = array<i64: 2, 32, 64>}, {pipeline_mode = #tpu.pipeline_mode<synchronous>, transform_indices = @transform_7, window_bounds = array<i64: 2, 1, 64>}, {pipeline_mode = #tpu.pipeline_mode<synchronous>, transform_indices = @transform_8, window_bounds = array<i64: 2, 64, 32>}, {pipeline_mode = #tpu.pipeline_mode<synchronous>, transform_indices = @transform_9, window_bounds = array<i64: 2, 1, 32>}, {pipeline_mode = #tpu.pipeline_mode<synchronous>, transform_indices = @transform_10, window_bounds = array<i64: 32, 32>}, {pipeline_mode = #tpu.pipeline_mode<synchronous>, transform_indices = @transform_11, window_bounds = array<i64: 1, 32>}, {pipeline_mode = #tpu.pipeline_mode<synchronous>, transform_indices = @transform_12, window_bounds = array<i64: 32, 2>}, {pipeline_mode = #tpu.pipeline_mode<synchronous>, transform_indices = @transform_13, window_bounds = array<i64: 1, 2>}, {pipeline_mode = #tpu.pipeline_mode<synchronous>, transform_indices = @transform_14, window_bounds = array<i64: 32, 6>}, {pipeline_mode = #tpu.pipeline_mode<synchronous>, transform_indices = @transform_15, window_bounds = array<i64: 38, 2>}, {pipeline_mode = #tpu.pipeline_mode<synchronous>, transform_indices = @transform_16, window_bounds = array<i64: 2, 128>}, {pipeline_mode = #tpu.pipeline_mode<synchronous>, transform_indices = @transform_17, window_bounds = array<i64: 16, 1>}]} {
    %c0 = arith.constant 0 : index
    %c0_0 = arith.constant 0 : index
    %0 = vector.load %arg1[%c0, %c0_0] : memref<16x16xbf16, #tpu.memory_space<vmem>>, vector<16x16xbf16>
    %c0_1 = arith.constant 0 : index
    %c0_2 = arith.constant 0 : index
    %1 = vector.load %arg2[%c0_1, %c0_2] : memref<16x2xi32, #tpu.memory_space<vmem>>, vector<16x2xi32>
    %2 = tpu.iota {dimensions = array<i32: 1>} : vector<16x8xi32>
    %3 = vector.extract_strided_slice %1 {offsets = [0, 0], sizes = [16, 1], strides = [1, 1]} : vector<16x2xi32> to vector<16x1xi32>
    %4 = vector.broadcast %3 : vector<16x1xi32> to vector<16x8xi32>
    %5 = arith.cmpi eq, %4, %2 : vector<16x8xi32>
    %6 = arith.extui %5 : vector<16x8xi1> to vector<16x8xi32>
    %7 = arith.sitofp %6 : vector<16x8xi32> to vector<16x8xf32>
    %8 = vector.extract_strided_slice %1 {offsets = [0, 1], sizes = [16, 1], strides = [1, 1]} : vector<16x2xi32> to vector<16x1xi32>
    %9 = vector.broadcast %8 : vector<16x1xi32> to vector<16x8xi32>
    %10 = arith.cmpi eq, %9, %2 : vector<16x8xi32>
    %11 = arith.extui %10 : vector<16x8xi1> to vector<16x8xi32>
    %12 = arith.sitofp %11 : vector<16x8xi32> to vector<16x8xf32>
    %13 = tpu.concatenate %7, %12 in 1 : vector<16x8xf32>, vector<16x8xf32> -> vector<16x16xf32>
    %c0_3 = arith.constant 0 : index
    %c0_4 = arith.constant 0 : index
    %14 = vector.load %arg3[%c0_3, %c0_4] : memref<16x32xf32, #tpu.memory_space<vmem>>, vector<16x32xf32>
    %cst = arith.constant dense<0.000000e+00> : vector<16x32xf32>
    %15 = tpu.matmul %13, %14, %cst {dimension_numbers = #tpu.dot_dimension_numbers<[1], [0], [0], [1], [0, 0, 1, 1], [], []>} : vector<16x16xf32>, vector<16x32xf32>, vector<16x32xf32> -> vector<16x32xf32>
    %16 = arith.truncf %15 : vector<16x32xf32> to vector<16x32xbf16>
    %cst_5 = arith.constant dense<0.000000e+00> : vector<16x32xf32>
    %17 = tpu.matmul %0, %16, %cst_5 {dimension_numbers = #tpu.dot_dimension_numbers<[1], [0], [0], [1], [0, 0, 1, 1], [], []>} : vector<16x16xbf16>, vector<16x32xbf16>, vector<16x32xf32> -> vector<16x32xf32>
    %cst_6 = arith.constant 1.000000e+00 : f32
    %18 = vector.broadcast %cst_6 : f32 to vector<16x32xf32>
    %19 = arith.mulf %18, %15 : vector<16x32xf32>
    %20 = arith.addf %19, %17 : vector<16x32xf32>
    %c0_7 = arith.constant 0 : index
    %c0_8 = arith.constant 0 : index
    %c0_9 = arith.constant 0 : index
    %21 = vector.load %arg7[%c0_7, %c0_8, %c0_9] : memref<2x32x64xbf16, #tpu.memory_space<vmem>>, vector<1x32x64xbf16>
    %22 = vector.shape_cast %21 : vector<1x32x64xbf16> to vector<32x64xbf16>
    %23 = arith.truncf %20 : vector<16x32xf32> to vector<16x32xbf16>
    %cst_10 = arith.constant dense<0.000000e+00> : vector<16x64xf32>
    %24 = tpu.matmul %23, %22, %cst_10 {dimension_numbers = #tpu.dot_dimension_numbers<[1], [0], [0], [1], [0, 0, 1, 1], [], []>} : vector<16x32xbf16>, vector<32x64xbf16>, vector<16x64xf32> -> vector<16x64xf32>
    %c0_11 = arith.constant 0 : index
    %c0_12 = arith.constant 0 : index
    %c0_13 = arith.constant 0 : index
    %25 = vector.load %arg8[%c0_11, %c0_12, %c0_13] : memref<2x1x64xf32, #tpu.memory_space<vmem>>, vector<1x1x64xf32>
    %26 = vector.shape_cast %25 : vector<1x1x64xf32> to vector<1x64xf32>
    %27 = vector.broadcast %26 : vector<1x64xf32> to vector<16x64xf32>
    %28 = arith.addf %24, %27 : vector<16x64xf32>
    %cst_14 = arith.constant 0.000000e+00 : f32
    %29 = vector.broadcast %cst_14 : f32 to vector<16x64xf32>
    %30 = arith.maximumf %28, %29 : vector<16x64xf32>
    %c0_15 = arith.constant 0 : index
    %c0_16 = arith.constant 0 : index
    %c0_17 = arith.constant 0 : index
    %31 = vector.load %arg9[%c0_15, %c0_16, %c0_17] : memref<2x64x32xbf16, #tpu.memory_space<vmem>>, vector<1x64x32xbf16>
    %32 = vector.shape_cast %31 : vector<1x64x32xbf16> to vector<64x32xbf16>
    %33 = arith.truncf %30 : vector<16x64xf32> to vector<16x64xbf16>
    %cst_18 = arith.constant dense<0.000000e+00> : vector<16x32xf32>
    %34 = tpu.matmul %33, %32, %cst_18 {dimension_numbers = #tpu.dot_dimension_numbers<[1], [0], [0], [1], [0, 0, 1, 1], [], []>} : vector<16x64xbf16>, vector<64x32xbf16>, vector<16x32xf32> -> vector<16x32xf32>
    %c0_19 = arith.constant 0 : index
    %c0_20 = arith.constant 0 : index
    %c0_21 = arith.constant 0 : index
    %35 = vector.load %arg10[%c0_19, %c0_20, %c0_21] : memref<2x1x32xf32, #tpu.memory_space<vmem>>, vector<1x1x32xf32>
    %36 = vector.shape_cast %35 : vector<1x1x32xf32> to vector<1x32xf32>
    %37 = vector.broadcast %36 : vector<1x32xf32> to vector<16x32xf32>
    %38 = arith.addf %34, %37 : vector<16x32xf32>
    %39 = arith.truncf %38 : vector<16x32xf32> to vector<16x32xbf16>
    %cst_22 = arith.constant dense<0.000000e+00> : vector<16x32xf32>
    %40 = tpu.matmul %0, %39, %cst_22 {dimension_numbers = #tpu.dot_dimension_numbers<[1], [0], [0], [1], [0, 0, 1, 1], [], []>} : vector<16x16xbf16>, vector<16x32xbf16>, vector<16x32xf32> -> vector<16x32xf32>
    %cst_23 = arith.constant 1.000000e+00 : f32
    %41 = vector.broadcast %cst_23 : f32 to vector<16x32xf32>
    %42 = arith.mulf %41, %38 : vector<16x32xf32>
    %43 = arith.addf %42, %40 : vector<16x32xf32>
    %c1 = arith.constant 1 : index
    %c0_24 = arith.constant 0 : index
    %c0_25 = arith.constant 0 : index
    %44 = vector.load %arg7[%c1, %c0_24, %c0_25] : memref<2x32x64xbf16, #tpu.memory_space<vmem>>, vector<1x32x64xbf16>
    %45 = vector.shape_cast %44 : vector<1x32x64xbf16> to vector<32x64xbf16>
    %46 = arith.truncf %43 : vector<16x32xf32> to vector<16x32xbf16>
    %cst_26 = arith.constant dense<0.000000e+00> : vector<16x64xf32>
    %47 = tpu.matmul %46, %45, %cst_26 {dimension_numbers = #tpu.dot_dimension_numbers<[1], [0], [0], [1], [0, 0, 1, 1], [], []>} : vector<16x32xbf16>, vector<32x64xbf16>, vector<16x64xf32> -> vector<16x64xf32>
    %c1_27 = arith.constant 1 : index
    %c0_28 = arith.constant 0 : index
    %c0_29 = arith.constant 0 : index
    %48 = vector.load %arg8[%c1_27, %c0_28, %c0_29] : memref<2x1x64xf32, #tpu.memory_space<vmem>>, vector<1x1x64xf32>
    %49 = vector.shape_cast %48 : vector<1x1x64xf32> to vector<1x64xf32>
    %50 = vector.broadcast %49 : vector<1x64xf32> to vector<16x64xf32>
    %51 = arith.addf %47, %50 : vector<16x64xf32>
    %cst_30 = arith.constant 0.000000e+00 : f32
    %52 = vector.broadcast %cst_30 : f32 to vector<16x64xf32>
    %53 = arith.maximumf %51, %52 : vector<16x64xf32>
    %c1_31 = arith.constant 1 : index
    %c0_32 = arith.constant 0 : index
    %c0_33 = arith.constant 0 : index
    %54 = vector.load %arg9[%c1_31, %c0_32, %c0_33] : memref<2x64x32xbf16, #tpu.memory_space<vmem>>, vector<1x64x32xbf16>
    %55 = vector.shape_cast %54 : vector<1x64x32xbf16> to vector<64x32xbf16>
    %56 = arith.truncf %53 : vector<16x64xf32> to vector<16x64xbf16>
    %cst_34 = arith.constant dense<0.000000e+00> : vector<16x32xf32>
    %57 = tpu.matmul %56, %55, %cst_34 {dimension_numbers = #tpu.dot_dimension_numbers<[1], [0], [0], [1], [0, 0, 1, 1], [], []>} : vector<16x64xbf16>, vector<64x32xbf16>, vector<16x32xf32> -> vector<16x32xf32>
    %c1_35 = arith.constant 1 : index
    %c0_36 = arith.constant 0 : index
    %c0_37 = arith.constant 0 : index
    %58 = vector.load %arg10[%c1_35, %c0_36, %c0_37] : memref<2x1x32xf32, #tpu.memory_space<vmem>>, vector<1x1x32xf32>
    %59 = vector.shape_cast %58 : vector<1x1x32xf32> to vector<1x32xf32>
    %60 = vector.broadcast %59 : vector<1x32xf32> to vector<16x32xf32>
    %61 = arith.addf %57, %60 : vector<16x32xf32>
    %c0_38 = arith.constant 0 : index
    %c0_39 = arith.constant 0 : index
    %62 = vector.load %arg11[%c0_38, %c0_39] : memref<32x32xbf16, #tpu.memory_space<vmem>>, vector<32x32xbf16>
    %63 = arith.truncf %61 : vector<16x32xf32> to vector<16x32xbf16>
    %cst_40 = arith.constant dense<0.000000e+00> : vector<16x32xf32>
    %64 = tpu.matmul %63, %62, %cst_40 {dimension_numbers = #tpu.dot_dimension_numbers<[1], [0], [0], [1], [0, 0, 1, 1], [], []>} : vector<16x32xbf16>, vector<32x32xbf16>, vector<16x32xf32> -> vector<16x32xf32>
    %c0_41 = arith.constant 0 : index
    %c0_42 = arith.constant 0 : index
    %65 = vector.load %arg12[%c0_41, %c0_42] : memref<1x32xf32, #tpu.memory_space<vmem>>, vector<1x32xf32>
    %66 = vector.broadcast %65 : vector<1x32xf32> to vector<16x32xf32>
    %67 = arith.addf %64, %66 : vector<16x32xf32>
    %68 = math.tanh %67 : vector<16x32xf32>
    %c0_43 = arith.constant 0 : index
    %c0_44 = arith.constant 0 : index
    %69 = vector.load %arg13[%c0_43, %c0_44] : memref<32x2xbf16, #tpu.memory_space<vmem>>, vector<32x2xbf16>
    %70 = arith.truncf %68 : vector<16x32xf32> to vector<16x32xbf16>
    %cst_45 = arith.constant dense<0.000000e+00> : vector<16x2xf32>
    %71 = tpu.matmul %70, %69, %cst_45 {dimension_numbers = #tpu.dot_dimension_numbers<[1], [0], [0], [1], [0, 0, 1, 1], [], []>} : vector<16x32xbf16>, vector<32x2xbf16>, vector<16x2xf32> -> vector<16x2xf32>
    %c0_46 = arith.constant 0 : index
    %c0_47 = arith.constant 0 : index
    %72 = vector.load %arg14[%c0_46, %c0_47] : memref<1x2xf32, #tpu.memory_space<vmem>>, vector<1x2xf32>
    %73 = vector.broadcast %72 : vector<1x2xf32> to vector<16x2xf32>
    %74 = arith.addf %71, %73 : vector<16x2xf32>
    %75 = vector.extract_strided_slice %74 {offsets = [0, 0], sizes = [16, 1], strides = [1, 1]} : vector<16x2xf32> to vector<16x1xf32>
    %76 = vector.extract_strided_slice %74 {offsets = [0, 1], sizes = [16, 1], strides = [1, 1]} : vector<16x2xf32> to vector<16x1xf32>
    %77 = arith.maximumf %75, %76 : vector<16x1xf32>
    %78 = arith.subf %75, %77 : vector<16x1xf32>
    %79 = math.exp %78 : vector<16x1xf32>
    %80 = arith.subf %76, %77 : vector<16x1xf32>
    %81 = math.exp %80 : vector<16x1xf32>
    %82 = arith.addf %79, %81 : vector<16x1xf32>
    %83 = tpu.reciprocal %82 {approx = true} : vector<16x1xf32> -> vector<16x1xf32>
    %84 = arith.mulf %79, %83 : vector<16x1xf32>
    %85 = arith.mulf %81, %83 : vector<16x1xf32>
    %c0_48 = arith.constant 0 : index
    %c0_49 = arith.constant 0 : index
    %86 = vector.load %arg5[%c0_48, %c0_49] : memref<16x2xf32, #tpu.memory_space<vmem>>, vector<16x2xf32>
    %87 = vector.extract_strided_slice %86 {offsets = [0, 0], sizes = [16, 1], strides = [1, 1]} : vector<16x2xf32> to vector<16x1xf32>
    %88 = arith.addf %84, %87 : vector<16x1xf32>
    %89 = vector.extract_strided_slice %86 {offsets = [0, 1], sizes = [16, 1], strides = [1, 1]} : vector<16x2xf32> to vector<16x1xf32>
    %90 = arith.addf %85, %89 : vector<16x1xf32>
    %91 = arith.maximumf %88, %90 : vector<16x1xf32>
    %92 = arith.subf %88, %91 : vector<16x1xf32>
    %93 = math.exp %92 : vector<16x1xf32>
    %94 = arith.subf %90, %91 : vector<16x1xf32>
    %95 = math.exp %94 : vector<16x1xf32>
    %96 = arith.addf %93, %95 : vector<16x1xf32>
    %97 = tpu.reciprocal %96 {approx = true} : vector<16x1xf32> -> vector<16x1xf32>
    %98 = arith.mulf %93, %97 : vector<16x1xf32>
    %99 = arith.mulf %95, %97 : vector<16x1xf32>
    %cst_50 = arith.constant dense<0.000000e+00> : vector<32xf32>
    %100 = vector.multi_reduction <add>, %61, %cst_50 [0] : vector<16x32xf32> to vector<32xf32>
    %101 = vector.shape_cast %100 : vector<32xf32> to vector<1x32xf32>
    %cst_51 = arith.constant 1.600000e+01 : f32
    %102 = vector.broadcast %cst_51 : f32 to vector<1x32xf32>
    %103 = arith.divf %101, %102 : vector<1x32xf32>
    %104 = vector.broadcast %103 : vector<1x32xf32> to vector<16x32xf32>
    %105 = arith.subf %61, %104 : vector<16x32xf32>
    %106 = arith.mulf %105, %105 : vector<16x32xf32>
    %cst_52 = arith.constant dense<0.000000e+00> : vector<32xf32>
    %107 = vector.multi_reduction <add>, %106, %cst_52 [0] : vector<16x32xf32> to vector<32xf32>
    %108 = vector.shape_cast %107 : vector<32xf32> to vector<1x32xf32>
    %cst_53 = arith.constant 0.0666666701 : f32
    %109 = vector.broadcast %cst_53 : f32 to vector<1x32xf32>
    %110 = arith.mulf %108, %109 : vector<1x32xf32>
    %111 = math.sqrt %110 : vector<1x32xf32>
    %112 = vector.broadcast %98 : vector<16x1xf32> to vector<16x32xf32>
    %113 = arith.mulf %112, %61 : vector<16x32xf32>
    %114 = vector.broadcast %99 : vector<16x1xf32> to vector<16x32xf32>
    %115 = vector.broadcast %103 : vector<1x32xf32> to vector<16x32xf32>
    %116 = arith.mulf %114, %115 : vector<16x32xf32>
    %117 = arith.addf %113, %116 : vector<16x32xf32>
    %118 = vector.broadcast %99 : vector<16x1xf32> to vector<16x32xf32>
    %119 = vector.broadcast %111 : vector<1x32xf32> to vector<16x32xf32>
    %120 = arith.mulf %118, %119 : vector<16x32xf32>
    %c0_54 = arith.constant 0 : index
    %c0_55 = arith.constant 0 : index
    %121 = vector.load %arg6[%c0_54, %c0_55] : memref<16x32xf32, #tpu.memory_space<vmem>>, vector<16x32xf32>
    %122 = arith.mulf %121, %120 : vector<16x32xf32>
    %123 = arith.addf %117, %122 : vector<16x32xf32>
    %c0_56 = arith.constant 0 : index
    %c0_57 = arith.constant 0 : index
    %124 = vector.load %arg4[%c0_56, %c0_57] : memref<2x16xf32, #tpu.memory_space<vmem>>, vector<2x16xf32>
    %cst_58 = arith.constant dense<0.000000e+00> : vector<2x32xf32>
    %125 = tpu.matmul %124, %123, %cst_58 {dimension_numbers = #tpu.dot_dimension_numbers<[1], [0], [0], [1], [0, 0, 1, 1], [], []>} : vector<2x16xf32>, vector<16x32xf32>, vector<2x32xf32> -> vector<2x32xf32>
    %cst_59 = arith.constant 1.000000e-07 : f32
    %126 = vector.broadcast %cst_59 : f32 to vector<1x32xf32>
    %127 = arith.addf %111, %126 : vector<1x32xf32>
    %cst_60 = arith.constant 1.000000e+00 : f32
    %128 = vector.broadcast %cst_60 : f32 to vector<1x32xf32>
    %129 = arith.divf %128, %127 : vector<1x32xf32>
    %130 = vector.broadcast %129 : vector<1x32xf32> to vector<16x32xf32>
    %131 = arith.mulf %120, %130 : vector<16x32xf32>
    %132 = arith.mulf %131, %131 : vector<16x32xf32>
    %cst_61 = arith.constant 5.000000e-01 : f32
    %133 = vector.broadcast %cst_61 : f32 to vector<16x32xf32>
    %134 = arith.mulf %133, %132 : vector<16x32xf32>
    %135 = vector.broadcast %103 : vector<1x32xf32> to vector<16x32xf32>
    %136 = arith.subf %117, %135 : vector<16x32xf32>
    %137 = vector.broadcast %129 : vector<1x32xf32> to vector<16x32xf32>
    %138 = arith.mulf %136, %137 : vector<16x32xf32>
    %139 = arith.mulf %138, %138 : vector<16x32xf32>
    %cst_62 = arith.constant dense<0.000000e+00> : vector<32xf32>
    %140 = vector.multi_reduction <add>, %139, %cst_62 [0] : vector<16x32xf32> to vector<32xf32>
    %141 = vector.shape_cast %140 : vector<32xf32> to vector<1x32xf32>
    %142 = vector.broadcast %141 : vector<1x32xf32> to vector<16x32xf32>
    %143 = arith.addf %134, %142 : vector<16x32xf32>
    %144 = vector.shape_cast %143 : vector<16x32xf32> to vector<1x16x32xf32>
    %cst_63 = arith.constant dense<0.000000e+00> : vector<1xf32>
    %145 = vector.multi_reduction <add>, %144, %cst_63 [1, 2] : vector<1x16x32xf32> to vector<1xf32>
    %146 = vector.shape_cast %145 : vector<1xf32> to vector<1x1x1xf32>
    %147 = vector.extract %146[0, 0, 0] : f32 from vector<1x1x1xf32>
    %148 = vector.broadcast %147 : f32 to vector<1x1xf32>
    %cst_64 = arith.constant 5.120000e+02 : f32
    %149 = vector.broadcast %cst_64 : f32 to vector<1x1xf32>
    %150 = arith.divf %148, %149 : vector<1x1xf32>
    %151 = tpu.concatenate %84, %85 in 1 : vector<16x1xf32>, vector<16x1xf32> -> vector<16x2xf32>
    %152 = arith.truncf %151 : vector<16x2xf32> to vector<16x2xbf16>
    %cst_65 = arith.constant dense<0.000000e+00> : vector<16x2xf32>
    %153 = tpu.matmul %0, %152, %cst_65 {dimension_numbers = #tpu.dot_dimension_numbers<[1], [0], [0], [1], [0, 0, 1, 1], [], []>} : vector<16x16xbf16>, vector<16x2xbf16>, vector<16x2xf32> -> vector<16x2xf32>
    %154 = vector.extract_strided_slice %153 {offsets = [0, 0], sizes = [16, 1], strides = [1, 1]} : vector<16x2xf32> to vector<16x1xf32>
    %155 = vector.extract_strided_slice %153 {offsets = [0, 1], sizes = [16, 1], strides = [1, 1]} : vector<16x2xf32> to vector<16x1xf32>
    %156 = vector.broadcast %154 : vector<16x1xf32> to vector<16x2xf32>
    %157 = arith.mulf %151, %156 : vector<16x2xf32>
    %158 = vector.broadcast %155 : vector<16x1xf32> to vector<16x2xf32>
    %159 = arith.mulf %151, %158 : vector<16x2xf32>
    %160 = tpu.concatenate %157, %159 in 1 : vector<16x2xf32>, vector<16x2xf32> -> vector<16x4xf32>
    %cst_66 = arith.constant 1.000000e+00 : f32
    %161 = vector.broadcast %cst_66 : f32 to vector<1x16xf32>
    %cst_67 = arith.constant dense<0.000000e+00> : vector<1x4xf32>
    %162 = tpu.matmul %161, %160, %cst_67 {dimension_numbers = #tpu.dot_dimension_numbers<[1], [0], [0], [1], [0, 0, 1, 1], [], []>} : vector<1x16xf32>, vector<16x4xf32>, vector<1x4xf32> -> vector<1x4xf32>
    %163 = vector.extract_strided_slice %162 {offsets = [0, 0], sizes = [1, 1], strides = [1, 1]} : vector<1x4xf32> to vector<1x1xf32>
    %164 = vector.extract_strided_slice %162 {offsets = [0, 1], sizes = [1, 1], strides = [1, 1]} : vector<1x4xf32> to vector<1x1xf32>
    %165 = vector.extract_strided_slice %162 {offsets = [0, 2], sizes = [1, 1], strides = [1, 1]} : vector<1x4xf32> to vector<1x1xf32>
    %166 = vector.extract_strided_slice %162 {offsets = [0, 3], sizes = [1, 1], strides = [1, 1]} : vector<1x4xf32> to vector<1x1xf32>
    %167 = math.absf %163 : vector<1x1xf32>
    %168 = math.absf %165 : vector<1x1xf32>
    %169 = arith.addf %167, %168 : vector<1x1xf32>
    %cst_68 = arith.constant 9.99999996E-13 : f32
    %170 = vector.broadcast %cst_68 : f32 to vector<1x1xf32>
    %171 = arith.maximumf %169, %170 : vector<1x1xf32>
    %172 = math.absf %164 : vector<1x1xf32>
    %173 = math.absf %166 : vector<1x1xf32>
    %174 = arith.addf %172, %173 : vector<1x1xf32>
    %cst_69 = arith.constant 9.99999996E-13 : f32
    %175 = vector.broadcast %cst_69 : f32 to vector<1x1xf32>
    %176 = arith.maximumf %174, %175 : vector<1x1xf32>
    %177 = arith.divf %163, %171 : vector<1x1xf32>
    %178 = arith.divf %166, %176 : vector<1x1xf32>
    %cst_70 = arith.constant 1.000000e+00 : f32
    %179 = vector.broadcast %cst_70 : f32 to vector<1x1xf32>
    %180 = arith.subf %177, %179 : vector<1x1xf32>
    %181 = arith.mulf %180, %180 : vector<1x1xf32>
    %cst_71 = arith.constant 1.000000e+00 : f32
    %182 = vector.broadcast %cst_71 : f32 to vector<1x1xf32>
    %183 = arith.subf %178, %182 : vector<1x1xf32>
    %184 = arith.mulf %183, %183 : vector<1x1xf32>
    %185 = arith.addf %181, %184 : vector<1x1xf32>
    %cst_72 = arith.constant 5.000000e-01 : f32
    %186 = vector.broadcast %cst_72 : f32 to vector<1x1xf32>
    %187 = arith.mulf %186, %185 : vector<1x1xf32>
    %c0_73 = arith.constant 0 : index
    %c0_74 = arith.constant 0 : index
    %188 = vector.load %arg15[%c0_73, %c0_74] : memref<32x6xf32, #tpu.memory_space<vmem>>, vector<32x6xf32>
    %cst_75 = arith.constant dense<0.000000e+00> : vector<2x6xf32>
    %189 = tpu.matmul %125, %188, %cst_75 {dimension_numbers = #tpu.dot_dimension_numbers<[1], [0], [0], [1], [0, 0, 1, 1], [], []>} : vector<2x32xf32>, vector<32x6xf32>, vector<2x6xf32> -> vector<2x6xf32>
    %190 = arith.mulf %125, %125 : vector<2x32xf32>
    %cst_76 = arith.constant dense<0.000000e+00> : vector<2xf32>
    %191 = vector.multi_reduction <add>, %190, %cst_76 [1] : vector<2x32xf32> to vector<2xf32>
    %192 = vector.shape_cast %191 : vector<2xf32> to vector<2x1xf32>
    %193 = arith.mulf %188, %188 : vector<32x6xf32>
    %cst_77 = arith.constant dense<0.000000e+00> : vector<6xf32>
    %194 = vector.multi_reduction <add>, %193, %cst_77 [0] : vector<32x6xf32> to vector<6xf32>
    %195 = vector.shape_cast %194 : vector<6xf32> to vector<1x6xf32>
    %cst_78 = arith.constant -2.000000e+00 : f32
    %196 = vector.broadcast %cst_78 : f32 to vector<2x6xf32>
    %197 = arith.mulf %196, %189 : vector<2x6xf32>
    %198 = vector.broadcast %192 : vector<2x1xf32> to vector<2x6xf32>
    %199 = arith.addf %197, %198 : vector<2x6xf32>
    %200 = vector.broadcast %195 : vector<1x6xf32> to vector<2x6xf32>
    %201 = arith.addf %199, %200 : vector<2x6xf32>
    %cst_79 = arith.constant 1.000000e+00 : f32
    %202 = vector.broadcast %cst_79 : f32 to vector<2x6xf32>
    %203 = arith.addf %201, %202 : vector<2x6xf32>
    %cst_80 = arith.constant 9.99999974E-5 : f32
    %204 = vector.broadcast %cst_80 : f32 to vector<2x6xf32>
    %205 = arith.addf %201, %204 : vector<2x6xf32>
    %206 = arith.divf %203, %205 : vector<2x6xf32>
    %207 = math.log %206 : vector<2x6xf32>
    %208 = tpu.concatenate %207, %125 in 1 : vector<2x6xf32>, vector<2x32xf32> -> vector<2x38xf32>
    %c0_81 = arith.constant 0 : index
    %c0_82 = arith.constant 0 : index
    %209 = vector.load %arg16[%c0_81, %c0_82] : memref<38x2xbf16, #tpu.memory_space<vmem>>, vector<38x2xbf16>
    %210 = arith.truncf %208 : vector<2x38xf32> to vector<2x38xbf16>
    %cst_83 = arith.constant dense<0.000000e+00> : vector<2x2xf32>
    %211 = tpu.matmul %210, %209, %cst_83 {dimension_numbers = #tpu.dot_dimension_numbers<[1], [0], [0], [1], [0, 0, 1, 1], [], []>} : vector<2x38xbf16>, vector<38x2xbf16>, vector<2x2xf32> -> vector<2x2xf32>
    %212 = vector.extract_strided_slice %211 {offsets = [0, 0], sizes = [2, 1], strides = [1, 1]} : vector<2x2xf32> to vector<2x1xf32>
    %213 = vector.extract_strided_slice %211 {offsets = [0, 1], sizes = [2, 1], strides = [1, 1]} : vector<2x2xf32> to vector<2x1xf32>
    %214 = arith.maximumf %212, %213 : vector<2x1xf32>
    %215 = arith.subf %212, %214 : vector<2x1xf32>
    %216 = math.exp %215 : vector<2x1xf32>
    %217 = arith.subf %213, %214 : vector<2x1xf32>
    %218 = math.exp %217 : vector<2x1xf32>
    %219 = arith.addf %216, %218 : vector<2x1xf32>
    %220 = tpu.reciprocal %219 {approx = true} : vector<2x1xf32> -> vector<2x1xf32>
    %221 = arith.mulf %216, %220 : vector<2x1xf32>
    %222 = arith.mulf %218, %220 : vector<2x1xf32>
    %223 = tpu.concatenate %221, %222 in 1 : vector<2x1xf32>, vector<2x1xf32> -> vector<2x2xf32>
    %224 = vector.shape_cast %150 : vector<1x1xf32> to vector<1x1xf32>
    %225 = vector.broadcast %224 : vector<1x1xf32> to vector<2x1xf32>
    %226 = vector.shape_cast %187 : vector<1x1xf32> to vector<1x1xf32>
    %227 = vector.broadcast %226 : vector<1x1xf32> to vector<2x1xf32>
    %cst_84 = arith.constant 0.000000e+00 : f32
    %228 = vector.broadcast %cst_84 : f32 to vector<2x78xf32>
    %229 = tpu.concatenate %211, %223, %207, %201, %125, %225, %227, %228 in 1 : vector<2x2xf32>, vector<2x2xf32>, vector<2x6xf32>, vector<2x6xf32>, vector<2x32xf32>, vector<2x1xf32>, vector<2x1xf32>, vector<2x78xf32> -> vector<2x128xf32>
    %c0_85 = arith.constant 0 : index
    %c0_86 = arith.constant 0 : index
    %230 = vector.load %arg17[%c0_85, %c0_86] : memref<2x128xf32, #tpu.memory_space<vmem>>, vector<2x128xf32>
    tpu.vector_store %arg17[%c0_85, %c0_86], %229 {strides = array<i32>} : memref<2x128xf32, #tpu.memory_space<vmem>>, vector<2x128xf32>,
    %c0_87 = arith.constant 0 : index
    %c0_88 = arith.constant 0 : index
    %231 = vector.load %arg18[%c0_87, %c0_88] : memref<16x1xf32, #tpu.memory_space<vmem>>, vector<16x1xf32>
    tpu.vector_store %arg18[%c0_87, %c0_88], %98 {strides = array<i32>} : memref<16x1xf32, #tpu.memory_space<vmem>>, vector<16x1xf32>,
    return
  }
  func.func @transform_0(%arg0: i32) -> (i32, i32) {
    %c0_i32 = arith.constant 0 : i32
    %c0_i32_0 = arith.constant 0 : i32
    %c0_i32_1 = arith.constant 0 : i32
    return %c0_i32, %c0_i32_0 : i32, i32
  }
  func.func @transform_1(%arg0: i32) -> (i32, i32) {
    %c0_i32 = arith.constant 0 : i32
    %c0_i32_0 = arith.constant 0 : i32
    %c0_i32_1 = arith.constant 0 : i32
    return %c0_i32, %c0_i32_0 : i32, i32
  }
  func.func @transform_2(%arg0: i32) -> (i32, i32) {
    %c0_i32 = arith.constant 0 : i32
    %c0_i32_0 = arith.constant 0 : i32
    %c0_i32_1 = arith.constant 0 : i32
    return %c0_i32, %c0_i32_0 : i32, i32
  }
  func.func @transform_3(%arg0: i32) -> (i32, i32) {
    %c0_i32 = arith.constant 0 : i32
    %c0_i32_0 = arith.constant 0 : i32
    %c0_i32_1 = arith.constant 0 : i32
    return %c0_i32, %c0_i32_0 : i32, i32
  }
  func.func @transform_4(%arg0: i32) -> (i32, i32) {
    %c0_i32 = arith.constant 0 : i32
    %c0_i32_0 = arith.constant 0 : i32
    %c0_i32_1 = arith.constant 0 : i32
    return %c0_i32, %c0_i32_0 : i32, i32
  }
  func.func @transform_5(%arg0: i32) -> (i32, i32) {
    %c0_i32 = arith.constant 0 : i32
    %c0_i32_0 = arith.constant 0 : i32
    %c0_i32_1 = arith.constant 0 : i32
    return %c0_i32, %c0_i32_0 : i32, i32
  }
  func.func @transform_6(%arg0: i32) -> (i32, i32, i32) {
    %c0_i32 = arith.constant 0 : i32
    %c0_i32_0 = arith.constant 0 : i32
    %c0_i32_1 = arith.constant 0 : i32
    %c0_i32_2 = arith.constant 0 : i32
    return %c0_i32, %c0_i32_0, %c0_i32_1 : i32, i32, i32
  }
  func.func @transform_7(%arg0: i32) -> (i32, i32, i32) {
    %c0_i32 = arith.constant 0 : i32
    %c0_i32_0 = arith.constant 0 : i32
    %c0_i32_1 = arith.constant 0 : i32
    %c0_i32_2 = arith.constant 0 : i32
    return %c0_i32, %c0_i32_0, %c0_i32_1 : i32, i32, i32
  }
  func.func @transform_8(%arg0: i32) -> (i32, i32, i32) {
    %c0_i32 = arith.constant 0 : i32
    %c0_i32_0 = arith.constant 0 : i32
    %c0_i32_1 = arith.constant 0 : i32
    %c0_i32_2 = arith.constant 0 : i32
    return %c0_i32, %c0_i32_0, %c0_i32_1 : i32, i32, i32
  }
  func.func @transform_9(%arg0: i32) -> (i32, i32, i32) {
    %c0_i32 = arith.constant 0 : i32
    %c0_i32_0 = arith.constant 0 : i32
    %c0_i32_1 = arith.constant 0 : i32
    %c0_i32_2 = arith.constant 0 : i32
    return %c0_i32, %c0_i32_0, %c0_i32_1 : i32, i32, i32
  }
  func.func @transform_10(%arg0: i32) -> (i32, i32) {
    %c0_i32 = arith.constant 0 : i32
    %c0_i32_0 = arith.constant 0 : i32
    %c0_i32_1 = arith.constant 0 : i32
    return %c0_i32, %c0_i32_0 : i32, i32
  }
  func.func @transform_11(%arg0: i32) -> (i32, i32) {
    %c0_i32 = arith.constant 0 : i32
    %c0_i32_0 = arith.constant 0 : i32
    %c0_i32_1 = arith.constant 0 : i32
    return %c0_i32, %c0_i32_0 : i32, i32
  }
  func.func @transform_12(%arg0: i32) -> (i32, i32) {
    %c0_i32 = arith.constant 0 : i32
    %c0_i32_0 = arith.constant 0 : i32
    %c0_i32_1 = arith.constant 0 : i32
    return %c0_i32, %c0_i32_0 : i32, i32
  }
  func.func @transform_13(%arg0: i32) -> (i32, i32) {
    %c0_i32 = arith.constant 0 : i32
    %c0_i32_0 = arith.constant 0 : i32
    %c0_i32_1 = arith.constant 0 : i32
    return %c0_i32, %c0_i32_0 : i32, i32
  }
  func.func @transform_14(%arg0: i32) -> (i32, i32) {
    %c0_i32 = arith.constant 0 : i32
    %c0_i32_0 = arith.constant 0 : i32
    %c0_i32_1 = arith.constant 0 : i32
    return %c0_i32, %c0_i32_0 : i32, i32
  }
  func.func @transform_15(%arg0: i32) -> (i32, i32) {
    %c0_i32 = arith.constant 0 : i32
    %c0_i32_0 = arith.constant 0 : i32
    %c0_i32_1 = arith.constant 0 : i32
    return %c0_i32, %c0_i32_0 : i32, i32
  }
  func.func @transform_16(%arg0: i32) -> (i32, i32) {
    %c0_i32 = arith.constant 0 : i32
    %c0_i32_0 = arith.constant 0 : i32
    %c0_i32_1 = arith.constant 0 : i32
    return %c0_i32, %c0_i32_0 : i32, i32
  }
  func.func @transform_17(%arg0: i32) -> (i32, i32) {
    %c0_i32 = arith.constant 0 : i32
    %c0_i32_0 = arith.constant 0 : i32
    %c0_i32_1 = arith.constant 0 : i32
    return %c0_i32, %c0_i32_0 : i32, i32
  }
}

</mosaic_0001>

<bundles_post_ra>
// kernel: gnn_nets_forward.1
= control target key start
LH: loop header
LB: loop body
LE: loop exit
PB: predicated region body
PF: predicated region fallthrough
CT: control target
= control target key end

     0   :  { %v1258_v0 = vmov 1   ;;  %v1259_v2 = vmov 0   ;;  %v60_v4 = vlaneseq  ;;  %v1260_v8 = vmov 0.0   ;;  %s1261_s29 = smov 8   ;;  %s1647_s1 = inlined_call_operand.vmem [shape: s32[16,2], index: 1, kind: input, shape index: {}]   ;;  %s1648_s2 = inlined_call_operand.vmem [shape: f32[16,32], index: 2, kind: input, shape index: {}]   ;;  %s1649_s0 = inlined_call_operand.vmem [shape: bf16[16,16], index: 0, kind: input, shape index: {}]   ;;  %s1650_s7 = inlined_call_operand.vmem [shape: f32[2,1,64], index: 7, kind: input, shape index: {}]   ;;  %s1651_s6 = inlined_call_operand.vmem [shape: bf16[2,32,64], index: 6, kind: input, shape index: {}]   ;;  %s1652_s9 = inlined_call_operand.vmem [shape: f32[2,1,32], index: 9, kind: input, shape index: {}]   ;;  %s1653_s8 = inlined_call_operand.vmem [shape: bf16[2,64,32], index: 8, kind: input, shape index: {}]   ;;  %s1654_s11 = inlined_call_operand.vmem [shape: f32[1,32], index: 11, kind: input, shape index: {}]   ;;  %s1655_s10 = inlined_call_operand.vmem [shape: bf16[32,32], index: 10, kind: input, shape index: {}]   ;;  %s1656_s13 = inlined_call_operand.vmem [shape: f32[1,2], index: 13, kind: input, shape index: {}]   ;;  %s1657_s12 = inlined_call_operand.vmem [shape: bf16[32,2], index: 12, kind: input, shape index: {}]   ;;  %s1658_s4 = inlined_call_operand.vmem [shape: f32[16,2], index: 4, kind: input, shape index: {}]   ;;  %s1659_s17 = inlined_call_operand.vmem [shape: f32[16,1], index: 17, kind: output, shape index: {1}]   ;;  %s1660_s14 = inlined_call_operand.vmem [shape: f32[32,6], index: 14, kind: input, shape index: {}]   ;;  %s1661_s5 = inlined_call_operand.vmem [shape: f32[16,32], index: 5, kind: input, shape index: {}]   ;;  %s1662_s3 = inlined_call_operand.vmem [shape: f32[2,16], index: 3, kind: input, shape index: {}]   ;;  %s1663_s15 = inlined_call_operand.vmem [shape: bf16[38,2], index: 15, kind: input, shape index: {}]   ;;  %s1664_s16 = inlined_call_operand.vmem [shape: f32[2,128], index: 16, kind: output, shape index: {0}]  }
   0x1   :  { %1667 = sst [smem:[#allocation2_spill]] %s1647_s1  ;;  %1183 = vset.pattern.permute.xlu0 %v1258_v0  ;;  %1184 = vset.pattern.permute.xlu1 %v1259_v2  ;;  %vm94_vm4 = vcmask 64512   ;;  %vm99_vm5 = vcmask 130048   ;;  %v1387_v26 = vld [vmem:[%s1649_s0] sm:$0xff]  ;;  %v1145_v27 = vld [vmem:[%s1651_s6 + $0x8] sm:$0xff]  ;;  %vm175_vm6 = vcmask 261120  }
   0x2   :  { %1668 = sst [smem:[#allocation3_spill]] %s1648_s2  ;;  %1191 = vset.pattern.permute.xlu2 %v1259_v2  ;;  %v61_v5 = vand.u32 127, %v60_v4  ;;  %185 = vmatpush.bf16.msra.mxu2 %v1145_v27  ;;  %v1144_v28 = vld [vmem:[%s1651_s6] sm:$0xff]  ;;  %v1149_v34 = vld [vmem:[%s1653_s8 + $0x18] sm:$0xff]  ;;  %v1148_v35 = vld [vmem:[%s1653_s8 + $0x10] sm:$0xff]  ;;  %vm232_vm7 = vcmask 523264  }
   0x3   :  { %s1669_s26 = sld [smem:[#allocation2_spill]]  ;;  %240 = vmatpush.bf16.msra.mxu3 %v1149_v34  ;;  %v1147_v36 = vld [vmem:[%s1653_s8 + $0x8] sm:$0xff]  ;;  %v1146_v37 = vld [vmem:[%s1653_s8] sm:$0xff]  ;;  %v1151_v52 = vld [vmem:[%s1651_s6 + $0x18] sm:$0xff]  ;;  %vm718_vm8 = vcmask 7168   ;;  %s1272_s1 = smov 16  }
   0x4   :  { %s1670_s18 = sld [smem:[#allocation3_spill]]  ;;  %v1202_v39 = vld [vmem:[%s1650_s7] ss:$0 sm:$0xff]  ;;  %v1150_v53 = vld [vmem:[%s1651_s6 + $0x10] sm:$0xff]  ;;  %v1155_v59 = vld [vmem:[%s1653_s8 + $0x38] sm:$0xff]  ;;  %s1269_s6 = smov 10  }
   0x5   :  { %v1203_v47 = vld [vmem:[%s1652_s9] ss:$0 sm:$0xff]  ;;  %v1154_v60 = vld [vmem:[%s1653_s8 + $0x30] sm:$0xff]  ;;  %v1153_v61 = vld [vmem:[%s1653_s8 + $0x28] sm:$0xff] }
   0x6   :  { %186 = vmatpush.bf16.msra.mxu2 %v1144_v28  ;;  %v1152_v62 = vld [vmem:[%s1653_s8 + $0x20] sm:$0xff] }
   0x7   :  { %241 = vmatpush.bf16.msra.mxu3 %v1148_v35  ;;  %v1207_v28 = vld [vmem:[%s1656_s13] ss:$0 sm:$0xff] }
   0x9   :  { %v58_v1 = vld [vmem:[%s1669_s26] sm:$0xff]  ;;  %v59_v3 = vld [vmem:[%s1669_s26 + $0x8] sm:$0xff] }
   0xa   :  { %75 = vperm.xlu0 %1183, %v58_v1   ;;  %63 = vperm.xlu1 %1184, %v58_v1   ;;  %v98_v16 = vld [vmem:[%s1670_s18 + $0x8] sm:$0xff]  ;;  %v97_v17 = vld [vmem:[%s1670_s18] sm:$0xff] }
   0xb   :  { %120 = vmatpush.msra.mxu0 %v98_v16  ;;  %1162 = vmatpush.msra.mxu1 %v98_v16  ;;  %v1204_v1 = vld [vmem:[%s1650_s7 + $0x1] ss:$0 sm:$0xff] }
   0xc   :  { %242 = vmatpush.bf16.msra.mxu3 %v1147_v36  ;;  %355 = vmatpush.bf16.msrb.mxu2 %v1155_v59 }
   0xd   :  { %121 = vmatpush.msra.mxu0 %v97_v17  ;;  %1163 = vmatpush.msra.mxu1 %v97_v17  ;;  %v1159_v17 = vld [vmem:[%s1657_s12 + $0x8] sm:$0xff] }
  0x10   :  { %243 = vmatpush.bf16.msra.mxu3 %v1146_v37  ;;  %356 = vmatpush.bf16.msrb.mxu2 %v1154_v60 }
  0x12   :  { %78 = vperm.xlu0 %1183, %v59_v3   ;;  %66 = vperm.xlu1 %1184, %v59_v3  }
  0x14   :  { %357 = vmatpush.bf16.msrb.mxu2 %v1153_v61  ;;  %v498_v61 = vld [vmem:[%s1658_s4 + $0x8] sm:$0xff] }
  0x18   :  { %358 = vmatpush.bf16.msrb.mxu2 %v1152_v62 }
  0x1a   :  { %1190 = vset.pattern.permute.xlu0 %v1259_v2  ;;  %1192 = vset.pattern.permute.xlu1 %v1258_v0 }
  0x7c   :  { %v76_v6 = vpop.permute.xlu0 %75  ;;  %v64_v7 = vpop.permute.xlu1 %63 }
  0x7d   :  { %vm68_vm0 = vcmp.eq.s32.totalorder %v64_v7, %v61_v5  ;;  %vm80_vm1 = vcmp.eq.s32.totalorder %v76_v6, %v61_v5 }
  0x7e   :  { %v1032_v9 = vsel %vm68_vm0, 1.0, %v1260_v8  ;;  %v1034_v12 = vsel %vm80_vm1, 1.0, %v1260_v8  ;;  %vm879_vm0 = vcmask 48128   ;;  %vm871_vm1 = vcmask 254976  }
  0x84   :  { %v79_v10 = vpop.permute.xlu0 %78  ;;  %v67_v11 = vpop.permute.xlu1 %66 }
  0x85   :  { %vm81_vm2 = vcmp.eq.s32.totalorder %v79_v10, %v61_v5  ;;  %vm69_vm3 = vcmp.eq.s32.totalorder %v67_v11, %v61_v5  ;;  %v1156_v10 = vld [vmem:[%s1655_s10] sm:$0xff] }
  0x86   :  { %v1035_v13 = vsel %vm81_vm2, 1.0, %v1260_v8  ;;  %v1033_v14 = vsel %vm69_vm3, 1.0, %v1260_v8  ;;  %vm944_vm2 = vcmask 1042432   ;;  %vm766_vm3 = vcmask 15360  }
  0x87   :  { %v1185_v15 = vpack.i.bf16 %v1035_v13, %v1034_v12  ;;  %v1205_v12 = vld [vmem:[%s1652_s9 + $0x1] ss:$0 sm:$0xff]  ;;  %s1266_s9 = smov 2  }
  0x89   :  { %1186 = vrot.lane.b32.xlu2 %v1185_v15, %s1261_s29 }
  0xe3   :  { %v1187_v18 = vpop.permute.xlu2 %1186 }
  0xe4   :  { %v1189_v19 = vunpack.i.h.bf16 %v1187_v18  ;;  %v1188_v20 = vunpack.i.l.bf16 %v1187_v18  ;;  %v1158_v18 = vld [vmem:[%s1657_s12] sm:$0xff]  ;;  %s1262_s12 = smov 127  }
  0xe6   :  { %v95_v21 = vsel %vm94_vm4, %v1032_v9, %v1188_v20  ;;  %v96_v22 = vsel %vm94_vm4, %v1033_v14, %v1189_v19  ;;  %v1157_v9 = vld [vmem:[%s1655_s10 + $0x8] sm:$0xff]  ;;  %v1206_v20 = vld [vmem:[%s1654_s11] ss:$0 sm:$0xff]  ;;  %s1263_s11 = smov 1  }
  0xe7   :  { %1036 = vmatmul.msk.f32.vlgmr.msra.gmra.mxu0 %vm99_vm5, %v95_v21  ;;  %1037 = vmatmul.msk.f32.vlgmr.msra.gmra.mxu1 %vm99_vm5, %v96_v22 }
  0xe8   :  { %395 = vmatpush.bf16.msrb.mxu3 %v1157_v9 }
  0xec   :  { %396 = vmatpush.bf16.msrb.mxu3 %v1156_v10 }
 0x164   :  { %v123_v23 = vpop.f32.mrf.mxu0  ;;  %v126_v24 = vpop.f32.mrf.mxu1 }
 0x165   :  { %v129_v25 = vpack.c.bf16 %v126_v24, %v123_v23 }
 0x167   :  { %145 = vmatpush.bf16.msrb.mxu1 %v129_v25 }
 0x16a   :  { %1042 = vmatmul.msk.bf16.vlgmr.msrb.gmra.mxu1 %vm99_vm5, %v1387_v26 }
 0x16b   :  { %299 = vmatpush.bf16.msra.mxu1 %v1151_v52 }
 0x16f   :  { %300 = vmatpush.bf16.msra.mxu1 %v1150_v53 }
 0x1e7   :  { %v147_v29 = vpop.f32.mrf.mxu1 }
 0x1e8   :  { %v152_v31 = vadd.f32 %v147_v29, %v123_v23 }
 0x1ef   :  { %v149_v30 = vpop.f32.mrf.mxu1 }
 0x1f0   :  { %v153_v32 = vadd.f32 %v149_v30, %v126_v24 }
 0x1f2   :  { %v158_v33 = vpack.c.bf16 %v153_v32, %v152_v31 }
 0x1f4   :  { %1051 = vmatmul.msk.bf16.vlgmr.msra.gmra.mxu2 %vm175_vm6, %v158_v33 }
 0x277   :  { %v188_v38 = vpop.f32.mrf.mxu2 }
 0x278   :  { %v189_v40 = vadd.f32 %v1202_v39, %v188_v38 }
 0x27a   :  { %v193_v43 = vmax.f32 %v189_v40, 0.0 }
 0x27f   :  { %v190_v41 = vpop.f32.mrf.mxu2 }
 0x280   :  { %v191_v42 = vadd.f32 %v1202_v39, %v190_v41 }
 0x282   :  { %v194_v44 = vmax.f32 %v191_v42, 0.0 }
 0x284   :  { %v203_v45 = vpack.c.bf16 %v194_v44, %v193_v43 }
 0x286   :  { %1068 = vmatmul.msk.bf16.vlgmr.msra.gmra.mxu3 %vm232_vm7, %v203_v45 }
 0x309   :  { %v245_v46 = vpop.f32.mrf.mxu3 }
 0x30a   :  { %v246_v49 = vadd.f32 %v1203_v47, %v245_v46 }
 0x311   :  { %v247_v48 = vpop.f32.mrf.mxu3 }
 0x312   :  { %v248_v50 = vadd.f32 %v1203_v47, %v247_v48 }
 0x314   :  { %v250_v51 = vpack.c.bf16 %v248_v50, %v246_v49 }
 0x316   :  { %258 = vmatpush.bf16.msrb.mxu0 %v250_v51 }
 0x319   :  { %1069 = vmatmul.msk.bf16.vlgmr.msrb.gmra.mxu0 %vm99_vm5, %v1387_v26 }
 0x31a   :  { %435 = vmatpush.bf16.msra.mxu0 %v1159_v17 }
 0x31e   :  { %436 = vmatpush.bf16.msra.mxu0 %v1158_v18 }
 0x396   :  { %v260_v54 = vpop.f32.mrf.mxu0 }
 0x397   :  { %v265_v56 = vadd.f32 %v260_v54, %v246_v49 }
 0x39e   :  { %v262_v55 = vpop.f32.mrf.mxu0 }
 0x39f   :  { %v266_v57 = vadd.f32 %v262_v55, %v248_v50 }
 0x3a1   :  { %v272_v58 = vpack.c.bf16 %v266_v57, %v265_v56 }
 0x3a3   :  { %1083 = vmatmul.msk.bf16.vlgmr.msra.gmra.mxu1 %vm175_vm6, %v272_v58 }
 0x420   :  { %v302_v63 = vpop.f32.mrf.mxu1 }
 0x421   :  { %v303_v3 = vadd.f32 %v1204_v1, %v302_v63 }
 0x423   :  { %v307_v6 = vmax.f32 %v303_v3, 0.0  ;;  %v497_v3 = vld [vmem:[%s1658_s4] sm:$0xff]  ;;  %s1271_s4 = smov 4  }
 0x428   :  { %v304_v4 = vpop.f32.mrf.mxu1 }
 0x429   :  { %v305_v5 = vadd.f32 %v1204_v1, %v304_v4 }
 0x42b   :  { %v308_v7 = vmax.f32 %v305_v5, 0.0 }
 0x42d   :  { %v318_v8 = vpack.c.bf16 %v308_v7, %v307_v6 }
 0x42f   :  { %1109 = vmatmul.msk.bf16.vlgmr.msrb.gmra.mxu2 %vm232_vm7, %v318_v8 }
 0x4b2   :  { %v360_v11 = vpop.f32.mrf.mxu2 }
 0x4b3   :  { %v1451_v14 = vadd.f32 %v1205_v12, %v360_v11 }
 0x4ba   :  { %v362_v13 = vpop.f32.mrf.mxu2 }
 0x4bb   :  { %v1453_v15 = vadd.f32 %v1205_v12, %v362_v13 }
 0x4bd   :  { %v369_v16 = vpack.c.bf16 %v1453_v15, %v1451_v14 }
 0x4bf   :  { %1118 = vmatmul.msk.bf16.vlgmr.msrb.gmra.mxu3 %vm175_vm6, %v369_v16 }
 0x542   :  { %v398_v19 = vpop.f32.mrf.mxu3 }
 0x543   :  { %v399_v21 = vadd.f32 %v1206_v20, %v398_v19 }
 0x545   :  { %1208 = vtanh.f32 %v399_v21 }
 0x54a   :  { %v400_v22 = vpop.f32.mrf.mxu3 }
 0x54b   :  { %v401_v23 = vadd.f32 %v1206_v20, %v400_v22  ;;  %v1209_v24 = vpop.eup %1208 }
 0x54d   :  { %1210 = vtanh.f32 %v401_v23 }
 0x553   :  { %v1211_v25 = vpop.eup %1210 }
 0x554   :  { %v409_v27 = vpack.c.bf16 %v1211_v25, %v1209_v24 }
 0x556   :  { %1127 = vmatmul.msk.bf16.vlgmr.msra.gmra.mxu0 %vm175_vm6, %v409_v27 }
 0x5d3   :  { %v438_v29 = vpop.f32.mrf.mxu0 }
 0x5d4   :  { %v439_v30 = vadd.f32 %v1207_v28, %v438_v29 }
 0x5d6   :  { %445 = vrot.lane.b32.xlu0 %v439_v30, %s1262_s12 }
 0x5db   :  { %v440_v31 = vpop.f32.mrf.mxu0 }
 0x5dc   :  { %v441_v32 = vadd.f32 %v1207_v28, %v440_v31 }
 0x5de   :  { %447 = vrot.lane.b32.xlu2 %v441_v32, %s1262_s12 }
 0x638   :  { %v448_v33 = vpop.permute.xlu2 %447 }
 0x639   :  { %v452_v34 = vmax.f32 %v441_v32, %v448_v33 }
 0x63b   :  { %463 = vrot.lane.b32.xlu1 %v452_v34, %s1263_s11  ;;  %v454_v47 = vsub.f32 %v441_v32, %v452_v34 }
 0x63d   :  { %v457_v48 = vmul.f32 1.442695, %v454_v47 }
 0x648   :  { %v446_v35 = vpop.permute.xlu0 %445 }
 0x649   :  { %v451_v36 = vmax.f32 %v439_v30, %v446_v35 }
 0x64b   :  { %461 = vrot.lane.b32.xlu2 %v451_v36, %s1263_s11  ;;  %v453_v45 = vsub.f32 %v439_v30, %v451_v36 }
 0x64d   :  { %v455_v46 = vmul.f32 1.442695, %v453_v45 }
 0x6a5   :  { %v462_v37 = vpop.permute.xlu2 %461 }
 0x6a6   :  { %v467_v38 = vsub.f32 %v439_v30, %v462_v37 }
 0x6a8   :  { %v469_v39 = vmul.f32 1.442695, %v467_v38 }
 0x6aa   :  { %1212 = vpow2.f32 %v469_v39 }
 0x6ad   :  { %v464_v40 = vpop.permute.xlu1 %463 }
 0x6ae   :  { %v468_v41 = vsub.f32 %v441_v32, %v464_v40  ;;  %v558_v40 = vsel %vm175_vm6, %v1453_v15, 0.0 }
 0x6b0   :  { %v1213_v42 = vpop.eup %1212  ;;  %v471_v43 = vmul.f32 1.442695, %v468_v41  ;;  %v557_v41 = vsel %vm175_vm6, %v1451_v14, 0.0 }
 0x6b1   :  { %475 = vrot.lane.b32.xlu1 %v1213_v42, %s1262_s12 }
 0x6b2   :  { %1214 = vpow2.f32 %v471_v43  ;;  %v1264_v43 = vmov 16.0  }
 0x6b3   :  { %1216 = vpow2.f32 %v455_v46 }
 0x6b4   :  { %1218 = vpow2.f32 %v457_v48 }
 0x6b8   :  { %v1215_v44 = vpop.eup %1214 }
 0x6b9   :  { %477 = vrot.lane.b32.xlu0 %v1215_v44, %s1262_s12  ;;  %v1217_v49 = vpop.eup %1216 }
 0x6ba   :  { %v1219_v52 = vpop.eup %1218 }
 0x723   :  { %v476_v50 = vpop.permute.xlu1 %475 }
 0x724   :  { %v481_v51 = vadd.f32 %v1217_v49, %v476_v50 }
 0x726   :  { %1220 = vrcp.f32 %v481_v51 }
 0x72b   :  { %v478_v53 = vpop.permute.xlu0 %477 }
 0x72c   :  { %v1221_v54 = vpop.eup %1220  ;;  %v482_v55 = vadd.f32 %v1219_v52, %v478_v53 }
 0x72d   :  { %v485_v56 = vmul.f32 %v1221_v54, %v1217_v49  ;;  %489 = vrot.lane.b32.xlu0 %v1221_v54, %s1263_s11 }
 0x72e   :  { %1222 = vrcp.f32 %v482_v55 }
 0x72f   :  { %v499_v8 = vadd.f32 %v497_v3, %v485_v56 }
 0x734   :  { %v1223_v57 = vpop.eup %1222 }
 0x735   :  { %v486_v58 = vmul.f32 %v1223_v57, %v1219_v52  ;;  %491 = vrot.lane.b32.xlu2 %v1223_v57, %s1263_s11 }
 0x737   :  { %v500_v12 = vadd.f32 %v498_v61, %v486_v58 }
 0x78f   :  { %v492_v59 = vpop.permute.xlu2 %491 }
 0x790   :  { %v496_v60 = vmul.f32 %v1215_v44, %v492_v59 }
 0x792   :  { %v502_v62 = vadd.f32 %v498_v61, %v496_v60  ;;  %v1487_v4 = vsel %vm718_vm8, %v486_v58, %v496_v60 }
 0x794   :  { %507 = vrot.lane.b32.xlu1 %v502_v62, %s1262_s12 }
 0x79f   :  { %v490_v63 = vpop.permute.xlu0 %489 }
 0x7a0   :  { %v495_v1 = vmul.f32 %v1213_v42, %v490_v63  ;;  %v559_v42 = vadd.f32 %v558_v40, %v557_v41 }
 0x7a2   :  { %v501_v5 = vadd.f32 %v497_v3, %v495_v1  ;;  %v1490_v6 = vsel %vm718_vm8, %v485_v56, %v495_v1  ;;  %v560_v44 = vrot.slane %v559_v42, 4 }
 0x7a3   :  { %v721_v7 = vpack.c.bf16 %v1487_v4, %v1490_v6 }
 0x7a4   :  { %505 = vrot.lane.b32.xlu2 %v501_v5, %s1262_s12  ;;  %v561_v46 = vadd.f32 %v560_v44, %v559_v42 }
 0x7a5   :  { %729 = vmatpush.bf16.msra.mxu2 %v721_v7 }
 0x7a6   :  { %v562_v48 = vrot.slane %v561_v46, 2 }
 0x7a8   :  { %1129 = vmatmul.msk.bf16.vlgmr.msra.gmra.mxu2 %vm99_vm5, %v1387_v26  ;;  %v563_v50 = vadd.f32 %v562_v48, %v561_v46 }
 0x7aa   :  { %v564_v53 = vrot.slane %v563_v50, 1 }
 0x7ac   :  { %v565_v55 = vadd.f32 %v564_v53, %v563_v50 }
 0x7fe   :  { %v506_v9 = vpop.permute.xlu2 %505 }
 0x7ff   :  { %v511_v10 = vmax.f32 %v499_v8, %v506_v9 }
 0x801   :  { %v513_v11 = vsub.f32 %v499_v8, %v511_v10  ;;  %521 = vrot.lane.b32.xlu1 %v511_v10, %s1263_s11 }
 0x803   :  { %v515_v30 = vmul.f32 1.442695, %v513_v11 }
 0x806   :  { %v508_v13 = vpop.permute.xlu1 %507 }
 0x807   :  { %v512_v16 = vmax.f32 %v500_v12, %v508_v13 }
 0x809   :  { %v514_v17 = vsub.f32 %v500_v12, %v512_v16  ;;  %523 = vrot.lane.b32.xlu0 %v512_v16, %s1263_s11 }
 0x80b   :  { %v517_v25 = vmul.f32 1.442695, %v514_v17 }
 0x82b   :  { %v1501_v31 = vpop.f32.mrf.mxu2 }
 0x833   :  { %v733_v37 = vpop.f32.mrf.mxu2 }
 0x873   :  { %v522_v18 = vpop.permute.xlu1 %521 }
 0x874   :  { %v527_v19 = vsub.f32 %v501_v5, %v522_v18 }
 0x876   :  { %v529_v20 = vmul.f32 1.442695, %v527_v19 }
 0x878   :  { %1224 = vpow2.f32 %v529_v20 }
 0x87b   :  { %v524_v21 = vpop.permute.xlu0 %523 }
 0x87c   :  { %v528_v22 = vsub.f32 %v502_v62, %v524_v21 }
 0x87e   :  { %v1225_v23 = vpop.eup %1224  ;;  %v531_v26 = vmul.f32 1.442695, %v528_v22 }
 0x87f   :  { %535 = vrot.lane.b32.xlu0 %v1225_v23, %s1262_s12 }
 0x880   :  { %1226 = vpow2.f32 %v531_v26 }
 0x881   :  { %1228 = vpow2.f32 %v517_v25 }
 0x886   :  { %v1227_v24 = vpop.eup %1226 }
 0x887   :  { %537 = vrot.lane.b32.xlu2 %v1227_v24, %s1262_s12  ;;  %v1229_v27 = vpop.eup %1228 }
 0x8e1   :  { %v538_v28 = vpop.permute.xlu2 %537 }
 0x8e2   :  { %v542_v29 = vadd.f32 %v1229_v27, %v538_v28  ;;  %v1538_v28 = vld [vmem:[%s1660_s14 + $0x10] sm:$0xff] }
 0x8e4   :  { %1230 = vrcp.f32 %v542_v29  ;;  %v1544_v29 = vld [vmem:[%s1660_s14 + $0x8] sm:$0xff] }
 0x8e5   :  { %1232 = vpow2.f32 %v515_v30 }
 0x8ea   :  { %v1231_v32 = vpop.eup %1230 }
 0x8eb   :  { %551 = vrot.lane.b32.xlu1 %v1231_v32, %s1263_s11  ;;  %v546_v33 = vmul.f32 %v1231_v32, %v1229_v27  ;;  %v1233_v34 = vpop.eup %1232  ;;  %v1533_v27 = vld [vmem:[%s1660_s14 + $0x18] sm:$0xff] }
 0x8ec   :  { %862 = vmatpush.msra.mxu3 %v1533_v27 }
 0x8ed   :  { %607 = vperm.xlu0 %1190, %v546_v33   ;;  %1023 = vst.msk [vmem:[%s1659_s17 + $0x8] sm:$0xff] %vm718_vm8, %v546_v33 }
 0x8ee   :  { %863 = vmatpush.msra.mxu3 %v1538_v28 }
 0x8f0   :  { %864 = vmatpush.msra.mxu3 %v1544_v29 }
 0x8f1   :  { %v536_v35 = vpop.permute.xlu0 %535 }
 0x8f2   :  { %v541_v36 = vadd.f32 %v1233_v34, %v536_v35  ;;  %v629_v35 = vld [vmem:[%s1661_s5 + $0x8] sm:$0xff] }
 0x8f4   :  { %1234 = vrcp.f32 %v541_v36 }
 0x8f5   :  { %1193 = vset.pattern.permute.xlu0 %v1258_v0  ;;  %1236 = vrcp.f32 %v1264_v43 }
 0x8f6   :  { %753 = vperm.xlu0 %1193, %v733_v37  }
 0x8fa   :  { %v1235_v38 = vpop.eup %1234 }
 0x8fb   :  { %549 = vrot.lane.b32.xlu2 %v1235_v38, %s1263_s11  ;;  %v545_v39 = vmul.f32 %v1235_v38, %v1233_v34  ;;  %v1237_v45 = vpop.eup %1236 }
 0x8fc   :  { %v567_v47 = vmul.f32 16.0, %v1237_v45  ;;  %vm571_vm9 = vweird.f32 %v1237_v45 }
 0x8fd   :  { %1022 = vst.msk [vmem:[%s1659_s17] sm:$0xff] %vm718_vm8, %v545_v39 }
 0x8fe   :  { %1194 = vset.pattern.permute.xlu0 %v1259_v2  ;;  %v568_v49 = vsub.f32 1.0, %v567_v47 }
 0x8ff   :  { %743 = vperm.xlu0 %1194, %v733_v37  }
 0x900   :  { %v569_v51 = vmul.f32 %v1237_v45, %v568_v49 }
 0x902   :  { %v570_v54 = vadd.f32 %v1237_v45, %v569_v51 }
 0x903   :  { %602 = vperm.xlu2 %1191, %v545_v39  }
 0x904   :  { %v572_v56 = vsel %vm571_vm9, %v1237_v45, %v570_v54 }
 0x905   :  { %v1520_v58 = vmul.f32 %v572_v56, %v565_v55 }
 0x907   :  { %1201 = vset.pattern.permute.xlu0 %v1258_v0  ;;  %v574_v60 = vsub.f32 %v1451_v14, %v1520_v58  ;;  %v575_v61 = vsub.f32 %v1453_v15, %v1520_v58 }
 0x909   :  { %v576_v62 = vmul.f32 %v574_v60, %v574_v60  ;;  %v577_v63 = vmul.f32 %v575_v61, %v575_v61  ;;  %v634_v60 = vld [vmem:[%s1662_s3] sm:$0x3] }
 0x90b   :  { %v578_v1 = vsel %vm175_vm6, %v576_v62, 0.0  ;;  %v579_v3 = vsel %vm175_vm6, %v577_v63, 0.0 }
 0x90c   :  { %v580_v5 = vadd.f32 %v579_v3, %v578_v1 }
 0x90e   :  { %v581_v7 = vrot.slane %v580_v5, 4 }
 0x910   :  { %v582_v8 = vadd.f32 %v581_v7, %v580_v5 }
 0x912   :  { %v583_v9 = vrot.slane %v582_v8, 2 }
 0x914   :  { %v584_v10 = vadd.f32 %v583_v9, %v582_v8 }
 0x916   :  { %v585_v11 = vrot.slane %v584_v10, 1 }
 0x918   :  { %v586_v12 = vadd.f32 %v585_v11, %v584_v10 }
 0x91a   :  { %v587_v13 = vmul.f32 0.06666667, %v586_v12 }
 0x91c   :  { %1238 = vrsqrt.f32 %v587_v13  ;;  %vm595_vm10 = vcmp.eq.f32.partialorder %v587_v13, inf  ;;  %v598_v26 = vand.u32 2147483648, %v587_v13  ;;  %vm597_vm11 = vcmp.eq.f32.partialorder %v587_v13, 0.0 }
 0x922   :  { %v1239_v16 = vpop.eup %1238 }
 0x923   :  { %v589_v17 = vmul.f32 %v1239_v16, %v587_v13 }
 0x925   :  { %v590_v18 = vmul.f32 %v1239_v16, %v589_v17 }
 0x927   :  { %v591_v19 = vmul.f32 0.5, %v590_v18 }
 0x929   :  { %v592_v20 = vsub.f32 1.5, %v591_v19 }
 0x92b   :  { %v593_v21 = vmul.f32 %v1239_v16, %v592_v20 }
 0x92d   :  { %v594_v22 = vmul.f32 %v593_v21, %v587_v13 }
 0x955   :  { %v550_v57 = vpop.permute.xlu2 %549 }
 0x956   :  { %v555_v59 = vmul.f32 %v1225_v23, %v550_v57  ;;  %v596_v23 = vsel %vm595_vm10, %v587_v13, %v594_v22  ;;  %vm940_vm10 = vcmask 310272  }
 0x95d   :  { %v552_v52 = vpop.permute.xlu1 %551  ;;  %v603_v46 = vpop.permute.xlu2 %602 }
 0x95e   :  { %v556_v0 = vmul.f32 %v1227_v24, %v552_v52  ;;  %v610_v51 = vmul.f32 %v603_v46, %v1451_v14 }
 0x95f   :  { %v608_v33 = vpop.permute.xlu0 %607 }
 0x960   :  { %619 = vperm.xlu1 %1192, %v556_v0   ;;  %v611_v37 = vmul.f32 %v608_v33, %v1453_v15  ;;  %v628_v15 = vld [vmem:[%s1661_s5] sm:$0xff] }
 0x968   :  { %614 = vperm.xlu1 %1192, %v555_v59  }
 0x970   :  { %749 = vperm.xlu1 %1192, %v1501_v31  }
 0x978   :  { %1195 = vset.pattern.permute.xlu1 %v1259_v2  ;;  %v599_v2 = vsel %vm597_vm11, %v598_v26, %v596_v23  ;;  %v876_v26 = vmul.f32 %v1544_v29, %v1544_v29 }
 0x979   :  { %v658_v24 = vadd.f32 1e-07, %v599_v2 }
 0x97b   :  { %1240 = vrcp.f32 %v658_v24  ;;  %v670_v43 = vand.u32 2147483648, %v658_v24  ;;  %vm664_vm13 = vweird.f32 %v658_v24  ;;  %v668_v44 = vand.u32 2147483647, %v658_v24 }
 0x97d   :  { %v671_v49 = vor.u32 1.1754944e-38, %v670_v43  ;;  %vm669_vm15 = vcmp.eq.f32.partialorder %v668_v44, 8.507059e+37 }
 0x981   :  { %v1241_v25 = vpop.eup %1240 }
 0x982   :  { %v660_v30 = vmul.f32 %v1241_v25, %v658_v24  ;;  %vm665_vm12 = vweird.f32 %v1241_v25  ;;  %v843_v24 = vld [vmem:[%s1660_s14] sm:$0xff]  ;;  %s1265_s14 = smov 6  }
 0x983   :  { %vm666_vm14 = vmor %vm664_vm13, %vm665_vm12  ;;  %865 = vmatpush.msra.mxu3 %v843_v24 }
 0x984   :  { %v661_v32 = vsub.f32 1.0, %v660_v30  ;;  %v881_v30 = vsel %vm879_vm0, %v876_v26, 0.0 }
 0x986   :  { %v662_v34 = vmul.f32 %v1241_v25, %v661_v32  ;;  %v875_v32 = vmul.f32 %v843_v24, %v843_v24 }
 0x988   :  { %v663_v40 = vadd.f32 %v1241_v25, %v662_v34  ;;  %v880_v34 = vsel %vm879_vm0, %v875_v32, 0.0 }
 0x989   :  { %v882_v29 = vadd.f32 %v881_v30, %v880_v34 }
 0x98a   :  { %v667_v47 = vsel %vm666_vm14, %v1241_v25, %v663_v40  ;;  %v878_v25 = vmul.f32 %v1533_v27, %v1533_v27  ;;  %v754_v40 = vpop.permute.xlu0 %753 }
 0x98b   :  { %v672_v0 = vsel %vm669_vm15, %v671_v49, %v667_v47  ;;  %v923_v49 = vld [vmem:[%s1663_s15 + $0x10] sm:$0x7] }
 0x9d2   :  { %v620_v36 = vpop.permute.xlu1 %619 }
 0x9d3   :  { %v623_v38 = vmul.f32 %v620_v36, %v1520_v58  ;;  %v627_v39 = vmul.f32 %v620_v36, %v599_v2 }
 0x9d5   :  { %v625_v41 = vadd.f32 %v623_v38, %v611_v37  ;;  %v631_v42 = vmul.f32 %v629_v35, %v627_v39  ;;  %v675_v7 = vmul.f32 %v672_v0, %v627_v39  ;;  %v885_v35 = vsel %vm879_vm0, %v878_v25, 0.0 }
 0x9d7   :  { %v633_v45 = vadd.f32 %v631_v42, %v625_v41  ;;  %v681_v48 = vsub.f32 %v625_v41, %v1520_v58  ;;  %v677_v10 = vmul.f32 %v675_v7, %v675_v7  ;;  %v757_v42 = vmul.f32 %v754_v40, %v1487_v4 }
 0x9d8   :  { %v1267_v7 = vmov 1.0  }
 0x9d9   :  { %652 = vmatpush.msrb.mxu1 %v633_v45  ;;  %v683_v54 = vmul.f32 %v681_v48, %v672_v0  ;;  %v679_v16 = vmul.f32 0.5, %v677_v10 }
 0x9da   :  { %v615_v50 = vpop.permute.xlu1 %614 }
 0x9db   :  { %v622_v52 = vmul.f32 %v615_v50, %v1520_v58  ;;  %v626_v53 = vmul.f32 %v615_v50, %v599_v2  ;;  %v685_v61 = vmul.f32 %v683_v54, %v683_v54  ;;  %v877_v2 = vmul.f32 %v1538_v28, %v1538_v28  ;;  %v1161_v54 = vld [vmem:[%s1663_s15 + $0x8] sm:$0xff] }
 0x9dd   :  { %v624_v55 = vadd.f32 %v622_v52, %v610_v51  ;;  %v630_v56 = vmul.f32 %v628_v15, %v626_v53  ;;  %v687_v63 = vsel %vm175_vm6, %v685_v61, 0.0  ;;  %v674_v8 = vmul.f32 %v672_v0, %v626_v53  ;;  %v744_v52 = vpop.permute.xlu0 %743 }
 0x9de   :  { %v883_v33 = vsel %vm879_vm0, %v877_v2, 0.0  ;;  %v934_v15 = vunpack.c.l.b16 %v923_v49 }
 0x9df   :  { %v680_v57 = vsub.f32 %v624_v55, %v1520_v58  ;;  %v632_v59 = vadd.f32 %v630_v56, %v624_v55  ;;  %v676_v11 = vmul.f32 %v674_v8, %v674_v8  ;;  %v884_v36 = vadd.f32 %v883_v33, %v882_v29 }
 0x9e0   :  { %v937_v50 = vpack.c.b16 %v934_v15, %v934_v15  ;;  %v747_v55 = vmul.f32 %v744_v52, %v1487_v4 }
 0x9e1   :  { %v682_v62 = vmul.f32 %v680_v57, %v672_v0  ;;  %653 = vmatpush.msrb.mxu1 %v632_v59  ;;  %v678_v17 = vmul.f32 0.5, %v676_v11  ;;  %v886_v28 = vadd.f32 %v885_v35, %v884_v36 }
 0x9e2   :  { %1128 = vmatmul.msk.f32.vlgmr.msrb.gmra.mxu1 %vm99_vm5, %v634_v60  ;;  %v750_v39 = vpop.permute.xlu1 %749  ;;  %v946_v51 = vsel %vm944_vm2, %v937_v50, 0 }
 0x9e3   :  { %v684_v14 = vmul.f32 %v682_v62, %v682_v62  ;;  %v756_v41 = vmul.f32 %v750_v39, %v1490_v6  ;;  %v887_v44 = vrot.slane %v886_v28, 4  ;;  %953 = vmatpush.bf16.msrb.mxu0 %v946_v51 }
 0x9e5   :  { %v686_v1 = vsel %vm175_vm6, %v684_v14, 0.0  ;;  %v1196_v43 = vpack.i.bf16 %v756_v41, %v757_v42  ;;  %v888_v46 = vadd.f32 %v887_v44, %v886_v28 }
 0x9e6   :  { %v688_v3 = vadd.f32 %v687_v63, %v686_v1 }
 0x9e7   :  { %v889_v47 = vrot.slane %v888_v46, 2  ;;  %954 = vmatpush.bf16.msrb.mxu0 %v1161_v54 }
 0x9e8   :  { %v689_v5 = vrot.slane %v688_v3, 4 }
 0x9ea   :  { %v690_v58 = vadd.f32 %v689_v5, %v688_v3  ;;  %v1160_v3 = vld [vmem:[%s1663_s15] sm:$0xff]  ;;  %s1268_s15 = smov 126  }
 0x9eb   :  { %955 = vmatpush.bf16.msrb.mxu0 %v1160_v3 }
 0x9ec   :  { %v691_v9 = vrot.slane %v690_v58, 2 }
 0x9ee   :  { %v692_v12 = vadd.f32 %v691_v9, %v690_v58 }
 0x9f0   :  { %v693_v13 = vrot.slane %v692_v12, 1 }
 0x9f2   :  { %v694_v18 = vadd.f32 %v693_v13, %v692_v12 }
 0x9f4   :  { %v695_v19 = vadd.f32 %v694_v18, %v678_v17  ;;  %v696_v20 = vadd.f32 %v694_v18, %v679_v16 }
 0x9f6   :  { %v697_v21 = vsel %vm175_vm6, %v695_v19, 0.0  ;;  %v698_v22 = vsel %vm175_vm6, %v696_v20, 0.0 }
 0x9f7   :  { %v1568_v23 = vadd.f32 %v698_v22, %v697_v21 }
 0xa5f   :  { %v1583_v37 = vpop.f32.mrf.mxu1 }
 0xa60   :  { %915 = vrot.lane.b32.xlu1 %v1583_v37, %s1265_s14  ;;  %1133 = vmatmul.msk.f32.vlgmr.msra.gmra.mxu3 %vm175_vm6, %v1583_v37  ;;  %v870_v27 = vmul.f32 %v1583_v37, %v1583_v37 }
 0xa62   :  { %v872_v38 = vsel %vm871_vm1, %v870_v27, 0.0 }
 0xa63   :  { %873 = vadd.xlane.f32.xlu2 %v872_v38 }
 0xa68   :  { %738 = vperm.xlu1 %1195, %v1501_v31   ;;  %v890_v31 = vadd.f32 %v889_v47, %v888_v46 }
 0xa6a   :  { %v891_v53 = vrot.slane %v890_v31, 1 }
 0xa6c   :  { %v892_v60 = vadd.f32 %v891_v53, %v890_v31 }
 0xa70   :  { %1197 = vrot.lane.b32.xlu1 %v1196_v43, %s1266_s9 }
 0xad2   :  { %v916_v45 = vpop.permute.xlu1 %915 }
 0xad6   :  { %v874_v14 = vpop.xlane.xlu2 %873 }
 0xada   :  { %v739_v48 = vpop.permute.xlu1 %738 }
 0xadb   :  { %v746_v62 = vmul.f32 %v739_v48, %v1490_v6 }
 0xae2   :  { %v1198_v0 = vpop.permute.xlu1 %1197 }
 0xae3   :  { %v1200_v56 = vunpack.i.h.bf16 %v1198_v0  ;;  %v1199_v57 = vunpack.i.l.bf16 %v1198_v0  ;;  %v867_v59 = vpop.f32.mrf.mxu3 }
 0xae4   :  { %v893_v61 = vmul.f32 -2.0, %v867_v59 }
 0xae5   :  { %v768_v63 = vsel %vm766_vm3, %v747_v55, %v1199_v57  ;;  %v767_v5 = vsel %vm766_vm3, %v746_v62, %v1200_v56 }
 0xae6   :  { %v894_v1 = vadd.f32 %v893_v61, %v874_v14  ;;  %786 = vmatpush.msra.mxu1 %v768_v63 }
 0xae8   :  { %v895_v4 = vadd.f32 %v894_v1, %v892_v60  ;;  %787 = vmatpush.msra.mxu1 %v767_v5 }
 0xae9   :  { %1130 = vmatmul.msk.f32.vlgmr.msra.gmra.mxu1 %vm99_vm5, %v1267_v7 }
 0xaea   :  { %v897_v8 = vadd.f32 0.0001, %v895_v4  ;;  %v896_v17 = vadd.f32 1.0, %v895_v4 }
 0xaec   :  { %1242 = vrcp.f32 %v897_v8  ;;  %v909_v10 = vand.u32 2147483648, %v897_v8  ;;  %v907_v12 = vand.u32 2147483647, %v897_v8  ;;  %vm903_vm6 = vweird.f32 %v897_v8 }
 0xaee   :  { %v910_v16 = vor.u32 1.1754944e-38, %v909_v10  ;;  %vm908_vm9 = vcmp.eq.f32.partialorder %v907_v12, 8.507059e+37 }
 0xaf2   :  { %v1243_v6 = vpop.eup %1242 }
 0xaf3   :  { %v899_v58 = vmul.f32 %v1243_v6, %v897_v8  ;;  %vm904_vm4 = vweird.f32 %v1243_v6 }
 0xaf4   :  { %vm905_vm7 = vmor %vm903_vm6, %vm904_vm4  ;;  %vm1010_vm4 = vcmask 31744  }
 0xaf5   :  { %v900_v9 = vsub.f32 1.0, %v899_v58 }
 0xaf7   :  { %v901_v11 = vmul.f32 %v1243_v6, %v900_v9 }
 0xaf9   :  { %v902_v13 = vadd.f32 %v1243_v6, %v901_v11 }
 0xafb   :  { %v906_v18 = vsel %vm905_vm7, %v1243_v6, %v902_v13  ;;  %vm1015_vm7 = vcmask 392192  }
 0xafc   :  { %v911_v19 = vsel %vm908_vm9, %v910_v16, %v906_v18  ;;  %vm1017_vm9 = vcmask 400384  }
 0xafd   :  { %v912_v20 = vmul.f32 %v911_v19, %v896_v17 }
 0xaff   :  { %1244 = vlog2.f32 %v912_v20 }
 0xb05   :  { %v1245_v21 = vpop.eup %1244 }
 0xb06   :  { %v1608_v22 = vmul.f32 0.6931472, %v1245_v21 }
 0xb08   :  { %v918_v26 = vsel %vm879_vm0, %v1608_v22, %v916_v45 }
 0xb09   :  { %v924_v2 = vpack.c.bf16 %v918_v26, %v918_v26 }
 0xb0b   :  { %1142 = vmatmul.msk.bf16.vlgmr.msrb.gmra.mxu0 %vm940_vm10, %v924_v2  ;;  %vm1019_vm10 = vcmask 408576  }
 0xb66   :  { %v1612_v24 = vpop.f32.mrf.mxu1 }
 0xb67   :  { %v792_v25 = vand.u32 2147483647, %v1612_v24 }
 0xb69   :  { %794 = vrot.lane.b32.xlu1 %v792_v25, %s1268_s15 }
 0xb88   :  { %v1615_v30 = vpop.f32.mrf.mxu0 }
 0xb89   :  { %962 = vrot.lane.b32.xlu0 %v1615_v30, %s1262_s12 }
 0xb90   :  { %v959_v32 = vpop.f32.mrf.mxu0 }
 0xbdb   :  { %v795_v33 = vpop.permute.xlu1 %794 }
 0xbdc   :  { %v797_v34 = vadd.f32 %v795_v33, %v792_v25 }
 0xbde   :  { %v1619_v29 = vmax.f32 %v797_v34, 1e-12 }
 0xbe0   :  { %815 = vrot.lane.b32.xlu0 %v1619_v29, %s1266_s9  ;;  %v810_v7 = vand.u32 2147483648, %v1619_v29  ;;  %vm804_vm15 = vweird.f32 %v1619_v29  ;;  %v808_v6 = vand.u32 2147483647, %v1619_v29 }
 0xbe2   :  { %v811_v58 = vor.u32 1.1754944e-38, %v810_v7  ;;  %vm809_vm2 = vcmp.eq.f32.partialorder %v808_v6, 8.507059e+37 }
 0xbfb   :  { %v963_v35 = vpop.permute.xlu0 %962 }
 0xbfc   :  { %v965_v36 = vmax.f32 %v1615_v30, %v963_v35 }
 0xbfe   :  { %970 = vrot.lane.b32.xlu2 %v965_v36, %s1263_s11 }
 0xc06   :  { %999 = vrot.lane.b32.xlu2 %v895_v4, %s1269_s6 }
 0xc0a   :  { %700 = vadd.xlane.f32.xlu0 %v1568_v23  ;;  %v966_v23 = vsub.f32 %v1615_v30, %v965_v36 }
 0xc0c   :  { %v967_v15 = vmul.f32 1.442695, %v966_v23 }
 0xc52   :  { %v816_v40 = vpop.permute.xlu0 %815 }
 0xc53   :  { %v829_v51 = vand.u32 2147483648, %v816_v40  ;;  %vm823_vm11 = vweird.f32 %v816_v40  ;;  %v827_v0 = vand.u32 2147483647, %v816_v40 }
 0xc55   :  { %v830_v55 = vor.u32 1.1754944e-38, %v829_v51  ;;  %vm828_vm14 = vcmp.eq.f32.partialorder %v827_v0, 8.507059e+37 }
 0xc58   :  { %v971_v28 = vpop.permute.xlu2 %970 }
 0xc59   :  { %v973_v27 = vsub.f32 %v1615_v30, %v971_v28 }
 0xc5b   :  { %v974_v38 = vmul.f32 1.442695, %v973_v27 }
 0xc5d   :  { %1246 = vpow2.f32 %v974_v38 }
 0xc5e   :  { %1248 = vrcp.f32 %v816_v40 }
 0xc5f   :  { %1250 = vpow2.f32 %v967_v15 }
 0xc60   :  { %v1000_v25 = vpop.permute.xlu2 %999 }
 0xc63   :  { %v1247_v39 = vpop.eup %1246 }
 0xc64   :  { %977 = vrot.lane.b32.xlu1 %v1247_v39, %s1262_s12  ;;  %v1249_v48 = vpop.eup %1248  ;;  %s1270_s12 = smov 125  }
 0xc65   :  { %v819_v49 = vmul.f32 %v1249_v48, %v816_v40  ;;  %vm824_vm12 = vweird.f32 %v1249_v48  ;;  %v1251_v53 = vpop.eup %1250 }
 0xc66   :  { %vm825_vm13 = vmor %vm823_vm11, %vm824_vm12 }
 0xc67   :  { %v820_v31 = vsub.f32 1.0, %v819_v49 }
 0xc69   :  { %v821_v50 = vmul.f32 %v1249_v48, %v820_v31 }
 0xc6b   :  { %v822_v52 = vadd.f32 %v1249_v48, %v821_v50 }
 0xc6d   :  { %v826_v57 = vsel %vm825_vm13, %v1249_v48, %v822_v52 }
 0xc6e   :  { %v831_v59 = vsel %vm828_vm14, %v830_v55, %v826_v57 }
 0xc6f   :  { %v832_v60 = vmul.f32 %v831_v59, %v1612_v24 }
 0xc71   :  { %v1132_v14 = vadd.f32 -1.0, %v832_v60 }
 0xc73   :  { %v836_v63 = vmul.f32 %v1132_v14, %v1132_v14 }
 0xc7d   :  { %v701_v41 = vpop.xlane.xlu0 %700 }
 0xc7e   :  { %v702_v42 = vrot.slane %v701_v41, 4 }
 0xc80   :  { %v703_v43 = vadd.f32 %v702_v42, %v701_v41 }
 0xc82   :  { %v704_v44 = vrot.slane %v703_v43, 2 }
 0xc84   :  { %v705_v45 = vadd.f32 %v704_v44, %v703_v43 }
 0xc86   :  { %v706_v46 = vrot.slane %v705_v45, 1 }
 0xc88   :  { %v707_v47 = vadd.f32 %v706_v46, %v705_v45 }
 0xc8a   :  { %1164 = vpush %v707_v47 }
 0xcbb   :  { %s1165_s30 = spop %1164 }
 0xcbc   :  { %v709_v27 = vstv %s1165_s30 }
 0xcd6   :  { %v978_v54 = vpop.permute.xlu1 %977 }
 0xcd7   :  { %v980_v56 = vadd.f32 %v1251_v53, %v978_v54 }
 0xcd9   :  { %1252 = vrcp.f32 %v980_v56 }
 0xcda   :  { %1254 = vrcp.f32 %v1619_v29 }
 0xcdf   :  { %v1253_v61 = vpop.eup %1252 }
 0xce0   :  { %984 = vrot.lane.b32.xlu1 %v1253_v61, %s1263_s11  ;;  %v982_v62 = vmul.f32 %v1253_v61, %v1251_v53  ;;  %v1255_v1 = vpop.eup %1254  ;;  %s1273_s11 = smov 49  }
 0xce1   :  { %v800_v3 = vmul.f32 %v1255_v1, %v1619_v29  ;;  %vm805_vm0 = vweird.f32 %v1255_v1 }
 0xce2   :  { %vm806_vm1 = vmor %vm804_vm15, %vm805_vm0 }
 0xce3   :  { %v801_v5 = vsub.f32 1.0, %v800_v3 }
 0xce5   :  { %v802_v4 = vmul.f32 %v1255_v1, %v801_v5 }
 0xce7   :  { %v803_v8 = vadd.f32 %v1255_v1, %v802_v4 }
 0xce8   :  { %838 = vrot.lane.b32.xlu1 %v836_v63, %s1270_s12 }
 0xce9   :  { %v807_v9 = vsel %vm806_vm1, %v1255_v1, %v803_v8 }
 0xcf0   :  { %995 = vrot.lane.b32.xlu1 %v1608_v22, %s1271_s4  ;;  %v1274_v22 = vmov 512.0  }
 0xcf1   :  { %1256 = vrcp.f32 %v1274_v22 }
 0xcf7   :  { %v1257_v26 = vpop.eup %1256 }
 0xcf8   :  { %1002 = vrot.lane.b32.xlu1 %v1583_v37, %s1272_s1  ;;  %v812_v37 = vsel %vm809_vm2, %v811_v58, %v807_v9  ;;  %v711_v2 = vmul.f32 512.0, %v1257_v26  ;;  %vm715_vm6 = vweird.f32 %v1257_v26 }
 0xcf9   :  { %v813_v10 = vmul.f32 %v812_v37, %v1612_v24 }
 0xcfa   :  { %v712_v24 = vsub.f32 1.0, %v711_v2 }
 0xcfb   :  { %v1131_v16 = vadd.f32 -1.0, %v813_v10 }
 0xcfc   :  { %v713_v33 = vmul.f32 %v1257_v26, %v712_v24 }
 0xcfd   :  { %v834_v17 = vmul.f32 %v1131_v16, %v1131_v16 }
 0xcfe   :  { %v714_v35 = vadd.f32 %v1257_v26, %v713_v33 }
 0xd00   :  { %v716_v38 = vsel %vm715_vm6, %v1257_v26, %v714_v35 }
 0xd01   :  { %v717_v41 = vmul.f32 %v716_v38, %v709_v27 }
 0xd52   :  { %v985_v11 = vpop.permute.xlu1 %984 }
 0xd53   :  { %v987_v12 = vmul.f32 %v1247_v39, %v985_v11 }
 0xd55   :  { %v988_v13 = vsel %vm718_vm8, %v982_v62, %v987_v12  ;;  %vm1012_vm8 = vcmask 80896  }
 0xd56   :  { %991 = vrot.lane.b32.xlu2 %v988_v13, %s1266_s9 }
 0xd5a   :  { %v839_v18 = vpop.permute.xlu1 %838 }
 0xd5b   :  { %v841_v19 = vadd.f32 %v839_v18, %v834_v17 }
 0xd5d   :  { %v842_v20 = vmul.f32 0.5, %v841_v19 }
 0xd5f   :  { %v989_v21 = vperm.slane %v842_v20, 0 }
 0xd61   :  { %1006 = vrot.lane.b32.xlu2 %v989_v21, %s1273_s11 }
 0xd62   :  { %v996_v32 = vpop.permute.xlu1 %995 }
 0xd6a   :  { %v1003_v39 = vpop.permute.xlu1 %1002 }
 0xdb0   :  { %v992_v34 = vpop.permute.xlu2 %991 }
 0xdb1   :  { %v1009_v29 = vsel %vm766_vm3, %v1615_v30, %v992_v34 }
 0xdb2   :  { %v1011_v36 = vsel %vm1010_vm4, %v1009_v29, %v996_v32 }
 0xdb3   :  { %v1013_v28 = vsel %vm1012_vm8, %v1011_v36, %v1000_v25 }
 0xdb4   :  { %v1014_v40 = vsel %vm99_vm5, %v1013_v28, %v1003_v39 }
 0xdb5   :  { %v1016_v43 = vsel %vm1015_vm7, %v1014_v40, %v717_v41 }
 0xdbb   :  { %v1007_v42 = vpop.permute.xlu2 %1006 }
 0xdbc   :  { %v1018_v44 = vsel %vm1017_vm9, %v1016_v43, %v1007_v42 }
 0xdbd   :  { %v1020_v45 = vsel %vm1019_vm10, %v1018_v44, 0.0 }
 0xdbe   :  { %1021 = vst [vmem:[%s1664_s16] sm:$0x3] %v1020_v45 }

</bundles_post_ra>
